<compile_context>
chip_gen: v6e
topology: v6e:2x2x1
jax: 0.10.0
libtpu: 0.0.40
codegen_flags: <defaults>
</compile_context>

<pallas_src>
import jax
import jax.numpy as jnp
import numpy as np
from jax.experimental import pallas as pl
from jax.experimental.pallas import tpu as pltpu

# ----------------------- model hyper-parameters (small) -----------------------
B, S, H = 2, 8, 32          # batch, sequence length, sequence_model_hidden_size
A = 64                      # attention_unit_size
F = 128                     # fc_hidden_size
NUM_CLASSES = (8, 8, 16)    # num_classes_list
T = sum(NUM_CLASSES)        # num_total_classes
BETA = 0.5
C_PAD = 16                  # per-level class weights padded to this width

# ------------------------- output slab layout (lane offsets) -------------------
C1, C2, C3 = NUM_CLASSES
OFF_SCORES = 0
OFF_GLOG = OFF_SCORES + T
OFF_V1 = OFF_GLOG + T
OFF_V2 = OFF_V1 + S
OFF_V3 = OFF_V2 + S
OFF_LG1 = OFF_V3 + S
OFF_LG2 = OFF_LG1 + C1
OFF_LG3 = OFF_LG2 + C2
OFF_SC1 = OFF_LG3 + C3
OFF_SC2 = OFF_SC1 + C1
OFF_AW1 = OFF_SC2 + C2
SLAB_USED = OFF_AW1 + S * C1      # 200
SLAB_W = 256                      # pad to a lane-dense multiple of 128


# --------------------------------- kernel ------------------------------------
def ham_kernel(
    x_ref,       # (TB, S, H) f32
    w1_ref,      # (3, H, A)      bf16
    wfc_ref,     # (3, 2H, F)     bf16
    bfc_ref,     # (3, 1, F)      f32
    w2_ref,      # (3, A, C_PAD)  bf16 (zero-padded cols)
    wl_ref,      # (3, F, C_PAD)  bf16 (zero-padded cols)
    bl_ref,      # (3, 1, C_PAD)  f32  (zero-padded cols)
    wg_ref, bg_ref, whw_ref, bhw_ref, wgs_ref, bgs_ref,
    slab_ref,    # (TB, SLAB_W) f32 lane-dense slab
):
    f32 = jnp.float32
    bf16 = jnp.bfloat16
    TB, S_, H_ = x_ref.shape

    x = x_ref[...]                                   # (TB, S, H)
    pool = jnp.mean(x, axis=1)                       # (TB, H)

    def dot(a, b):
        # MXU operands in bf16 (fewer vmatmul passes, half weight bytes);
        # f32 accumulation. All non-matmul math stays f32.
        return jnp.dot(a.astype(bf16), b, preferred_element_type=f32)

    def softmax_s(a):
        # softmax over the S axis (axis=1) of a (TB, S, c) tile
        m = jnp.max(a, axis=1, keepdims=True)
        e = jnp.exp(a - m)
        s = jnp.sum(e, axis=1, keepdims=True)
        return e * pl.reciprocal(s, approx=True)

    def level(l, x_l, c):
        xf = x_l.reshape(TB * S_, H_)                # flatten batch for 2D MXU ops
        t = jnp.tanh(dot(xf, w1_ref[l]))             # (TB*S, A)
        u = dot(t, w2_ref[l])                        # (TB*S, C_PAD)
        att = u.reshape(TB, S_, C_PAD)[:, :, :c]     # true class cols only
        att_w = softmax_s(att)                       # (TB, S, c), softmax over S
        # mean_C(att_w @ x) == sum_S mean_C(att_w) * x  -> pure VPU, no batched MXU
        w_bar = jnp.mean(att_w, axis=2, keepdims=True)       # (TB, S, 1)
        att_pool = jnp.sum(w_bar * x_l, axis=1)              # (TB, H)
        fc_in = jnp.concatenate([pool, att_pool], axis=1)    # (TB, 2H)
        fc_out = dot(fc_in, wfc_ref[l]) + bfc_ref[l]         # (TB, F)
        logits = (dot(fc_out, wl_ref[l]) + bl_ref[l])[:, :c] # (TB, c)
        scores = jax.nn.sigmoid(logits)                      # (TB, c)
        vis = softmax_s(att_w * scores[:, None, :])          # (TB, S, c)
        visual = jnp.mean(vis, axis=2)                       # (TB, S)
        return att_w, fc_out, logits, scores, visual

    aw1, fc1, lg1, sc1, v1 = level(0, x, C1)
    x2 = x * v1[:, :, None]
    _aw2, fc2, lg2, sc2, v2 = level(1, x2, C2)
    x3 = x * v2[:, :, None]
    _aw3, fc3, lg3, sc3, v3 = level(2, x3, C3)

    # global head: concat(fc1, fc2, fc3) @ (3F, F) in one matmul
    ham = jnp.concatenate([fc1, fc2, fc3], axis=1)           # (TB, 3F)
    fco = dot(ham, wg_ref[...]) + bg_ref[...]                # (TB, F)
    # highway_lin + highway_gate fused into one (F, 2F) matmul
    hw = dot(fco, whw_ref[...]) + bhw_ref[...]               # (TB, 2F)
    hg = jnp.maximum(hw[:, :F], 0.0)
    ht = jax.nn.sigmoid(hw[:, F:])
    highway = hg * ht + (1.0 - ht) * fco
    # TODO(synk): nn.Dropout is identity at inference time; no stochastic dropout applied.
    glogits = dot(highway, wgs_ref[...]) + bgs_ref[...]      # (TB, T)
    gscores = jax.nn.sigmoid(glogits)

    local_scores = jnp.concatenate([sc1, sc2, sc3], axis=1)  # (TB, T)
    scores = BETA * gscores + (1.0 - BETA) * local_scores

    # one lane-dense store for ALL outputs (first_att_weight folded in as lanes)
    aw1_flat = aw1.reshape(TB, S_ * C1)                      # (TB, S*C1)
    pad = jnp.zeros((TB, SLAB_W - SLAB_USED), f32)
    slab = jnp.concatenate(
        [scores, glogits, v1, v2, v3, lg1, lg2, lg3, sc1, sc2, aw1_flat, pad],
        axis=1)
    slab_ref[...] = slab


# ------------------------------ parameter setup -------------------------------
def trunc_normal(key, shape, std=0.1):
    return (std * jax.random.truncated_normal(key, -2.0, 2.0, shape)).astype(jnp.float32)


def make_raw_params(key):
    """Parameters in PyTorch nn.Linear layout: weight (out, in), bias (out,)."""
    names_shapes = [
        ('att1_fc1_w', (A, H)), ('att1_fc2_w', (NUM_CLASSES[0], A)),
        ('fc1_w', (F, 2 * H)), ('loc1_w', (NUM_CLASSES[0], F)),
        ('att2_fc1_w', (A, H)), ('att2_fc2_w', (NUM_CLASSES[1], A)),
        ('fc2_w', (F, 2 * H)), ('loc2_w', (NUM_CLASSES[1], F)),
        ('att3_fc1_w', (A, H)), ('att3_fc2_w', (NUM_CLASSES[2], A)),
        ('fc3_w', (F, 2 * H)), ('loc3_w', (NUM_CLASSES[2], F)),
        ('fc_w', (F, 3 * F)), ('hl_w', (F, F)), ('hg_w', (F, F)), ('gs_w', (T, F)),
    ]
    keys = jax.random.split(key, len(names_shapes))
    raw = {n: trunc_normal(k, s) for (n, s), k in zip(names_shapes, keys)}
    bias_shapes = {
        'fc1_b': (F,), 'loc1_b': (NUM_CLASSES[0],),
        'fc2_b': (F,), 'loc2_b': (NUM_CLASSES[1],),
        'fc3_b': (F,), 'loc3_b': (NUM_CLASSES[2],),
        'fc_b': (F,), 'hl_b': (F,), 'hg_b': (F,), 'gs_b': (T,),
    }
    for n, s in bias_shapes.items():
        raw[n] = jnp.full(s, 0.1, jnp.float32)
    return raw


def derive_kernel_params(raw):
    """Transpose / stack / pad / fuse into the (in, out) layout the kernel expects.

    MXU weight matrices are cast to bf16; biases stay f32 (VPU adds)."""
    bf16 = jnp.bfloat16

    def padc(a):
        c = a.shape[-1]
        if c == C_PAD:
            return a
        return jnp.pad(a, [(0, 0)] * (a.ndim - 1) + [(0, C_PAD - c)])

    w1_all = jnp.stack([raw[f'att{l}_fc1_w'].T for l in (1, 2, 3)]).astype(bf16)       # (3,H,A)
    wfc_all = jnp.stack([raw[f'fc{l}_w'].T for l in (1, 2, 3)]).astype(bf16)           # (3,2H,F)
    bfc_all = jnp.stack([raw[f'fc{l}_b'][None, :] for l in (1, 2, 3)])                 # (3,1,F) f32
    w2_all = jnp.stack([padc(raw[f'att{l}_fc2_w'].T) for l in (1, 2, 3)]).astype(bf16) # (3,A,CP)
    wl_all = jnp.stack([padc(raw[f'loc{l}_w'].T) for l in (1, 2, 3)]).astype(bf16)     # (3,F,CP)
    bl_all = jnp.stack([padc(raw[f'loc{l}_b'][None, :]) for l in (1, 2, 3)])           # (3,1,CP)

    return [
        w1_all, wfc_all, bfc_all, w2_all, wl_all, bl_all,
        raw['fc_w'].T.astype(bf16),                                            # (3F, F)
        raw['fc_b'][None, :],                                                  # (1, F)
        jnp.concatenate([raw['hl_w'].T, raw['hg_w'].T], axis=1).astype(bf16),  # (F, 2F)
        jnp.concatenate([raw['hl_b'], raw['hg_b']])[None, :],                  # (1, 2F)
        raw['gs_w'].T.astype(bf16),                                            # (F, T)
        raw['gs_b'][None, :],                                                  # (1, T)
    ]


# --------------------------------- wrapper ------------------------------------
def _const_spec(shape):
    nd = len(shape)
    return pl.BlockSpec(shape, lambda i, _nd=nd: (0,) * _nd)


def ham_forward(x, raw_params, tb=None):
    Bn = x.shape[0]
    if tb is None:
        # For large inference batches pick tb so tb*S >= 128 (v5e) / 256 (v6e, v7x),
        # e.g. tb=16 or tb=32. Tiny test batch -> one step covering the whole batch.
        tb = Bn
    assert Bn % tb == 0, "batch must be divisible by the per-step tile"
    nsteps = Bn // tb

    weights = derive_kernel_params(raw_params)

    in_specs = [pl.BlockSpec((tb, S, H), lambda i: (i, 0, 0))]
    in_specs += [_const_spec(tuple(w.shape)) for w in weights]
    out_spec = pl.BlockSpec((tb, SLAB_W), lambda i: (i, 0))

    # Advisory cost for the XLA scheduler.
    M = tb * S
    flops_per_step = (
        3 * (2 * M * H * A + 2 * M * A * C_PAD + 2 * tb * 2 * H * F + 2 * tb * F * C_PAD)
        + 2 * tb * 3 * F * F + 2 * tb * F * 2 * F + 2 * tb * F * T)
    trans_per_step = 3 * (M * A + 2 * M * C_PAD + tb * C_PAD) + tb * (F + 2 * T)
    weight_bytes = int(sum(int(np.prod(w.shape)) * w.dtype.itemsize for w in weights))
    cost = pl.CostEstimate(
        flops=int(flops_per_step * nsteps),
        transcendentals=int(trans_per_step * nsteps),
        bytes_accessed=int(weight_bytes + Bn * S * H * 4 + Bn * SLAB_W * 4),
    )

    slab = pl.pallas_call(
        ham_kernel,
        grid=(nsteps,),
        in_specs=in_specs,
        out_specs=out_spec,
        out_shape=jax.ShapeDtypeStruct((Bn, SLAB_W), jnp.float32),
        compiler_params=pltpu.CompilerParams(
            dimension_semantics=("parallel",),   # batch axis: independent per step
            vmem_limit_bytes=16 * 1024 * 1024,
        ),
        cost_estimate=cost,
    )(x, *weights)

    def sl(off, w):
        return slab[:, off:off + w]

    aw1 = sl(OFF_AW1, S * C1).reshape(Bn, S, C1)
    return {
        'scores': sl(OFF_SCORES, T),
        'first_att_weight': jnp.swapaxes(aw1, 1, 2),    # (B, C1, S)
        'first_visual': sl(OFF_V1, S),
        'second_visual': sl(OFF_V2, S),
        'third_visual': sl(OFF_V3, S),
        'first_logits': sl(OFF_LG1, C1),
        'second_logits': sl(OFF_LG2, C2),
        'third_logits': sl(OFF_LG3, C3),
        'global_logits': sl(OFF_GLOG, T),
        'first_scores': sl(OFF_SC1, C1),
        'second_scores': sl(OFF_SC2, C2),
    }


# ------------------------------ pure-JAX reference -----------------------------
def ham_reference(x, raw):
    def lin(v, w, b=None):
        y = v @ w.T
        return y if b is None else y + b

    def attention(xin, w1, w2):
        t = jnp.tanh(jnp.einsum('bsh,ah->bsa', xin, w1))
        am = jnp.swapaxes(jnp.einsum('bsa,ca->bsc', t, w2), 1, 2)
        aw = jax.nn.softmax(am, axis=-1)
        ao = jnp.einsum('bcs,bsh->bch', aw, xin)
        return aw, jnp.mean(ao, axis=1)

    def local(fc_out, aw, w, b):
        logits = lin(fc_out, w, b)
        scores = jax.nn.sigmoid(logits)
        vis = jax.nn.softmax(aw * scores[:, :, None], axis=-1)
        return logits, scores, jnp.mean(vis, axis=1)

    pool = jnp.mean(x, axis=1)
    aw1, ao1 = attention(x, raw['att1_fc1_w'], raw['att1_fc2_w'])
    fc1 = lin(jnp.concatenate([pool, ao1], axis=1), raw['fc1_w'], raw['fc1_b'])
    _, sc1, v1 = local(fc1, aw1, raw['loc1_w'], raw['loc1_b'])
    x2 = x * v1[:, :, None]
    aw2, ao2 = attention(x2, raw['att2_fc1_w'], raw['att2_fc2_w'])
    fc2 = lin(jnp.concatenate([pool, ao2], axis=1), raw['fc2_w'], raw['fc2_b'])
    _, sc2, v2 = local(fc2, aw2, raw['loc2_w'], raw['loc2_b'])
    x3 = x * v2[:, :, None]
    aw3, ao3 = attention(x3, raw['att3_fc1_w'], raw['att3_fc2_w'])
    fc3 = lin(jnp.concatenate([pool, ao3], axis=1), raw['fc3_w'], raw['fc3_b'])
    _, sc3, _ = local(fc3, aw3, raw['loc3_w'], raw['loc3_b'])
    ham = jnp.concatenate([fc1, fc2, fc3], axis=1)
    fco = lin(ham, raw['fc_w'], raw['fc_b'])
    hg = jax.nn.relu(lin(fco, raw['hl_w'], raw['hl_b']))
    ht = jax.nn.sigmoid(lin(fco, raw['hg_w'], raw['hg_b']))
    hw = hg * ht + (1.0 - ht) * fco
    glog = lin(hw, raw['gs_w'], raw['gs_b'])
    gsc = jax.nn.sigmoid(glog)
    local_scores = jnp.concatenate([sc1, sc2, sc3], axis=1)
    scores = BETA * gsc + (1.0 - BETA) * local_scores
    return scores, aw1, glog


# ----------------------------------- main --------------------------------------
if __name__ == "__main__":
    key = jax.random.PRNGKey(0)
    kx, kp = jax.random.split(key)
    x = jax.random.normal(kx, (B, S, H), jnp.float32)
    raw = make_raw_params(kp)

    outs = ham_forward(x, raw)
    outs = jax.block_until_ready(outs)

    ref_scores, ref_aw1, ref_glog = ham_reference(x, raw)
    # bf16 MXU operands + approx reciprocal -> slightly relaxed tolerances.
    np.testing.assert_allclose(np.asarray(outs['scores']), np.asarray(ref_scores),
                               rtol=2e-2, atol=2e-2)
    np.testing.assert_allclose(np.asarray(outs['first_att_weight']), np.asarray(ref_aw1),
                               rtol=2e-2, atol=2e-2)
    np.testing.assert_allclose(np.asarray(outs['global_logits']), np.asarray(ref_glog),
                               rtol=2e-2, atol=3e-2)
    print("KERNEL_OK")
</pallas_src>

<mosaic_0001>
module attributes {stable_mosaic.version = 11 : i64} {
  func.func @ham_kernel(%arg0: i32, %arg1: memref<2x8x32xf32, #tpu.memory_space<vmem>>, %arg2: memref<3x32x64xbf16, #tpu.memory_space<vmem>>, %arg3: memref<3x64x128xbf16, #tpu.memory_space<vmem>>, %arg4: memref<3x1x128xf32, #tpu.memory_space<vmem>>, %arg5: memref<3x64x16xbf16, #tpu.memory_space<vmem>>, %arg6: memref<3x128x16xbf16, #tpu.memory_space<vmem>>, %arg7: memref<3x1x16xf32, #tpu.memory_space<vmem>>, %arg8: memref<384x128xbf16, #tpu.memory_space<vmem>>, %arg9: memref<1x128xf32, #tpu.memory_space<vmem>>, %arg10: memref<128x256xbf16, #tpu.memory_space<vmem>>, %arg11: memref<1x256xf32, #tpu.memory_space<vmem>>, %arg12: memref<128x32xbf16, #tpu.memory_space<vmem>>, %arg13: memref<1x32xf32, #tpu.memory_space<vmem>>, %arg14: memref<2x256xf32, #tpu.memory_space<vmem>>) attributes {dimension_semantics = [#tpu.dimension_semantics<parallel>], iteration_bounds = array<i64: 1>, scalar_prefetch = 0 : i64, scratch_operands = 0 : i64, tpu.core_type = #tpu.core_type<tc>, window_params = [{transform_indices = @transform_0, window_bounds = array<i64: 2, 8, 32>}, {pipeline_mode = #tpu.pipeline_mode<synchronous>, transform_indices = @transform_1, window_bounds = array<i64: 3, 32, 64>}, {pipeline_mode = #tpu.pipeline_mode<synchronous>, transform_indices = @transform_2, window_bounds = array<i64: 3, 64, 128>}, {pipeline_mode = #tpu.pipeline_mode<synchronous>, transform_indices = @transform_3, window_bounds = array<i64: 3, 1, 128>}, {pipeline_mode = #tpu.pipeline_mode<synchronous>, transform_indices = @transform_4, window_bounds = array<i64: 3, 64, 16>}, {pipeline_mode = #tpu.pipeline_mode<synchronous>, transform_indices = @transform_5, window_bounds = array<i64: 3, 128, 16>}, {pipeline_mode = #tpu.pipeline_mode<synchronous>, transform_indices = @transform_6, window_bounds = array<i64: 3, 1, 16>}, {pipeline_mode = #tpu.pipeline_mode<synchronous>, transform_indices = @transform_7, window_bounds = array<i64: 384, 128>}, {pipeline_mode = #tpu.pipeline_mode<synchronous>, transform_indices = @transform_8, window_bounds = array<i64: 1, 128>}, {pipeline_mode = #tpu.pipeline_mode<synchronous>, transform_indices = @transform_9, window_bounds = array<i64: 128, 256>}, {pipeline_mode = #tpu.pipeline_mode<synchronous>, transform_indices = @transform_10, window_bounds = array<i64: 1, 256>}, {pipeline_mode = #tpu.pipeline_mode<synchronous>, transform_indices = @transform_11, window_bounds = array<i64: 128, 32>}, {pipeline_mode = #tpu.pipeline_mode<synchronous>, transform_indices = @transform_12, window_bounds = array<i64: 1, 32>}, {transform_indices = @transform_13, window_bounds = array<i64: 2, 256>}]} {
    %c0 = arith.constant 0 : index
    %c0_0 = arith.constant 0 : index
    %c0_1 = arith.constant 0 : index
    %0 = vector.load %arg1[%c0, %c0_0, %c0_1] : memref<2x8x32xf32, #tpu.memory_space<vmem>>, vector<2x8x32xf32>
    %cst = arith.constant dense<0.000000e+00> : vector<2x32xf32>
    %1 = vector.multi_reduction <add>, %0, %cst [1] : vector<2x8x32xf32> to vector<2x32xf32>
    %cst_2 = arith.constant 8.000000e+00 : f32
    %2 = vector.broadcast %cst_2 : f32 to vector<2x32xf32>
    %3 = arith.divf %1, %2 : vector<2x32xf32>
    %4 = vector.shape_cast %0 : vector<2x8x32xf32> to vector<16x32xf32>
    %c0_3 = arith.constant 0 : index
    %c0_4 = arith.constant 0 : index
    %c0_5 = arith.constant 0 : index
    %5 = vector.load %arg2[%c0_3, %c0_4, %c0_5] : memref<3x32x64xbf16, #tpu.memory_space<vmem>>, vector<1x32x64xbf16>
    %6 = vector.shape_cast %5 : vector<1x32x64xbf16> to vector<32x64xbf16>
    %7 = arith.truncf %4 : vector<16x32xf32> to vector<16x32xbf16>
    %cst_6 = arith.constant dense<0.000000e+00> : vector<16x64xf32>
    %8 = tpu.matmul %7, %6, %cst_6 {dimension_numbers = #tpu.dot_dimension_numbers<[1], [0], [0], [1], [0, 0, 1, 1], [], []>} : vector<16x32xbf16>, vector<32x64xbf16>, vector<16x64xf32> -> vector<16x64xf32>
    %9 = math.tanh %8 : vector<16x64xf32>
    %c0_7 = arith.constant 0 : index
    %c0_8 = arith.constant 0 : index
    %c0_9 = arith.constant 0 : index
    %10 = vector.load %arg5[%c0_7, %c0_8, %c0_9] : memref<3x64x16xbf16, #tpu.memory_space<vmem>>, vector<1x64x16xbf16>
    %11 = vector.shape_cast %10 : vector<1x64x16xbf16> to vector<64x16xbf16>
    %12 = arith.truncf %9 : vector<16x64xf32> to vector<16x64xbf16>
    %cst_10 = arith.constant dense<0.000000e+00> : vector<16x16xf32>
    %13 = tpu.matmul %12, %11, %cst_10 {dimension_numbers = #tpu.dot_dimension_numbers<[1], [0], [0], [1], [0, 0, 1, 1], [], []>} : vector<16x64xbf16>, vector<64x16xbf16>, vector<16x16xf32> -> vector<16x16xf32>
    %14 = vector.shape_cast %13 : vector<16x16xf32> to vector<2x8x16xf32>
    %15 = vector.extract_strided_slice %14 {offsets = [0, 0, 0], sizes = [2, 8, 8], strides = [1, 1, 1]} : vector<2x8x16xf32> to vector<2x8x8xf32>
    %cst_11 = arith.constant dense<0xFF800000> : vector<2x8xf32>
    %16 = vector.multi_reduction <maximumf>, %15, %cst_11 [1] : vector<2x8x8xf32> to vector<2x8xf32>
    %17 = vector.shape_cast %16 : vector<2x8xf32> to vector<2x1x8xf32>
    %18 = vector.broadcast %17 : vector<2x1x8xf32> to vector<2x8x8xf32>
    %19 = arith.subf %15, %18 : vector<2x8x8xf32>
    %20 = math.exp %19 : vector<2x8x8xf32>
    %cst_12 = arith.constant dense<0.000000e+00> : vector<2x8xf32>
    %21 = vector.multi_reduction <add>, %20, %cst_12 [1] : vector<2x8x8xf32> to vector<2x8xf32>
    %22 = vector.shape_cast %21 : vector<2x8xf32> to vector<2x1x8xf32>
    %23 = tpu.reciprocal %22 {approx = true} : vector<2x1x8xf32> -> vector<2x1x8xf32>
    %24 = vector.broadcast %23 : vector<2x1x8xf32> to vector<2x8x8xf32>
    %25 = arith.mulf %20, %24 : vector<2x8x8xf32>
    %cst_13 = arith.constant dense<0.000000e+00> : vector<2x8xf32>
    %26 = vector.multi_reduction <add>, %25, %cst_13 [2] : vector<2x8x8xf32> to vector<2x8xf32>
    %27 = vector.shape_cast %26 : vector<2x8xf32> to vector<2x8x1xf32>
    %cst_14 = arith.constant 8.000000e+00 : f32
    %28 = vector.broadcast %cst_14 : f32 to vector<2x8x1xf32>
    %29 = arith.divf %27, %28 : vector<2x8x1xf32>
    %30 = vector.broadcast %29 : vector<2x8x1xf32> to vector<2x8x32xf32>
    %31 = arith.mulf %30, %0 : vector<2x8x32xf32>
    %cst_15 = arith.constant dense<0.000000e+00> : vector<2x32xf32>
    %32 = vector.multi_reduction <add>, %31, %cst_15 [1] : vector<2x8x32xf32> to vector<2x32xf32>
    %33 = tpu.concatenate %3, %32 in 1 : vector<2x32xf32>, vector<2x32xf32> -> vector<2x64xf32>
    %c0_16 = arith.constant 0 : index
    %c0_17 = arith.constant 0 : index
    %c0_18 = arith.constant 0 : index
    %34 = vector.load %arg3[%c0_16, %c0_17, %c0_18] : memref<3x64x128xbf16, #tpu.memory_space<vmem>>, vector<1x64x128xbf16>
    %35 = vector.shape_cast %34 : vector<1x64x128xbf16> to vector<64x128xbf16>
    %36 = arith.truncf %33 : vector<2x64xf32> to vector<2x64xbf16>
    %cst_19 = arith.constant dense<0.000000e+00> : vector<2x128xf32>
    %37 = tpu.matmul %36, %35, %cst_19 {dimension_numbers = #tpu.dot_dimension_numbers<[1], [0], [0], [1], [0, 0, 1, 1], [], []>} : vector<2x64xbf16>, vector<64x128xbf16>, vector<2x128xf32> -> vector<2x128xf32>
    %c0_20 = arith.constant 0 : index
    %c0_21 = arith.constant 0 : index
    %c0_22 = arith.constant 0 : index
    %38 = vector.load %arg4[%c0_20, %c0_21, %c0_22] : memref<3x1x128xf32, #tpu.memory_space<vmem>>, vector<1x1x128xf32>
    %39 = vector.shape_cast %38 : vector<1x1x128xf32> to vector<1x128xf32>
    %40 = vector.broadcast %39 : vector<1x128xf32> to vector<2x128xf32>
    %41 = arith.addf %37, %40 : vector<2x128xf32>
    %c0_23 = arith.constant 0 : index
    %c0_24 = arith.constant 0 : index
    %c0_25 = arith.constant 0 : index
    %42 = vector.load %arg6[%c0_23, %c0_24, %c0_25] : memref<3x128x16xbf16, #tpu.memory_space<vmem>>, vector<1x128x16xbf16>
    %43 = vector.shape_cast %42 : vector<1x128x16xbf16> to vector<128x16xbf16>
    %44 = arith.truncf %41 : vector<2x128xf32> to vector<2x128xbf16>
    %cst_26 = arith.constant dense<0.000000e+00> : vector<2x16xf32>
    %45 = tpu.matmul %44, %43, %cst_26 {dimension_numbers = #tpu.dot_dimension_numbers<[1], [0], [0], [1], [0, 0, 1, 1], [], []>} : vector<2x128xbf16>, vector<128x16xbf16>, vector<2x16xf32> -> vector<2x16xf32>
    %c0_27 = arith.constant 0 : index
    %c0_28 = arith.constant 0 : index
    %c0_29 = arith.constant 0 : index
    %46 = vector.load %arg7[%c0_27, %c0_28, %c0_29] : memref<3x1x16xf32, #tpu.memory_space<vmem>>, vector<1x1x16xf32>
    %47 = vector.shape_cast %46 : vector<1x1x16xf32> to vector<1x16xf32>
    %48 = vector.broadcast %47 : vector<1x16xf32> to vector<2x16xf32>
    %49 = arith.addf %45, %48 : vector<2x16xf32>
    %50 = vector.extract_strided_slice %49 {offsets = [0, 0], sizes = [2, 8], strides = [1, 1]} : vector<2x16xf32> to vector<2x8xf32>
    %51 = arith.negf %50 : vector<2x8xf32>
    %52 = math.exp %51 : vector<2x8xf32>
    %cst_30 = arith.constant 1.000000e+00 : f32
    %53 = vector.broadcast %cst_30 : f32 to vector<2x8xf32>
    %54 = arith.addf %53, %52 : vector<2x8xf32>
    %55 = arith.divf %53, %54 : vector<2x8xf32>
    %56 = vector.shape_cast %55 : vector<2x8xf32> to vector<2x1x8xf32>
    %57 = vector.broadcast %56 : vector<2x1x8xf32> to vector<2x8x8xf32>
    %58 = arith.mulf %25, %57 : vector<2x8x8xf32>
    %cst_31 = arith.constant dense<0xFF800000> : vector<2x8xf32>
    %59 = vector.multi_reduction <maximumf>, %58, %cst_31 [1] : vector<2x8x8xf32> to vector<2x8xf32>
    %60 = vector.shape_cast %59 : vector<2x8xf32> to vector<2x1x8xf32>
    %61 = vector.broadcast %60 : vector<2x1x8xf32> to vector<2x8x8xf32>
    %62 = arith.subf %58, %61 : vector<2x8x8xf32>
    %63 = math.exp %62 : vector<2x8x8xf32>
    %cst_32 = arith.constant dense<0.000000e+00> : vector<2x8xf32>
    %64 = vector.multi_reduction <add>, %63, %cst_32 [1] : vector<2x8x8xf32> to vector<2x8xf32>
    %65 = vector.shape_cast %64 : vector<2x8xf32> to vector<2x1x8xf32>
    %66 = tpu.reciprocal %65 {approx = true} : vector<2x1x8xf32> -> vector<2x1x8xf32>
    %67 = vector.broadcast %66 : vector<2x1x8xf32> to vector<2x8x8xf32>
    %68 = arith.mulf %63, %67 : vector<2x8x8xf32>
    %cst_33 = arith.constant dense<0.000000e+00> : vector<2x8xf32>
    %69 = vector.multi_reduction <add>, %68, %cst_33 [2] : vector<2x8x8xf32> to vector<2x8xf32>
    %cst_34 = arith.constant 8.000000e+00 : f32
    %70 = vector.broadcast %cst_34 : f32 to vector<2x8xf32>
    %71 = arith.divf %69, %70 : vector<2x8xf32>
    %72 = vector.shape_cast %71 : vector<2x8xf32> to vector<2x8x1xf32>
    %73 = vector.broadcast %72 : vector<2x8x1xf32> to vector<2x8x32xf32>
    %74 = arith.mulf %0, %73 : vector<2x8x32xf32>
    %75 = vector.shape_cast %74 : vector<2x8x32xf32> to vector<16x32xf32>
    %c1 = arith.constant 1 : index
    %c0_35 = arith.constant 0 : index
    %c0_36 = arith.constant 0 : index
    %76 = vector.load %arg2[%c1, %c0_35, %c0_36] : memref<3x32x64xbf16, #tpu.memory_space<vmem>>, vector<1x32x64xbf16>
    %77 = vector.shape_cast %76 : vector<1x32x64xbf16> to vector<32x64xbf16>
    %78 = arith.truncf %75 : vector<16x32xf32> to vector<16x32xbf16>
    %cst_37 = arith.constant dense<0.000000e+00> : vector<16x64xf32>
    %79 = tpu.matmul %78, %77, %cst_37 {dimension_numbers = #tpu.dot_dimension_numbers<[1], [0], [0], [1], [0, 0, 1, 1], [], []>} : vector<16x32xbf16>, vector<32x64xbf16>, vector<16x64xf32> -> vector<16x64xf32>
    %80 = math.tanh %79 : vector<16x64xf32>
    %c1_38 = arith.constant 1 : index
    %c0_39 = arith.constant 0 : index
    %c0_40 = arith.constant 0 : index
    %81 = vector.load %arg5[%c1_38, %c0_39, %c0_40] : memref<3x64x16xbf16, #tpu.memory_space<vmem>>, vector<1x64x16xbf16>
    %82 = vector.shape_cast %81 : vector<1x64x16xbf16> to vector<64x16xbf16>
    %83 = arith.truncf %80 : vector<16x64xf32> to vector<16x64xbf16>
    %cst_41 = arith.constant dense<0.000000e+00> : vector<16x16xf32>
    %84 = tpu.matmul %83, %82, %cst_41 {dimension_numbers = #tpu.dot_dimension_numbers<[1], [0], [0], [1], [0, 0, 1, 1], [], []>} : vector<16x64xbf16>, vector<64x16xbf16>, vector<16x16xf32> -> vector<16x16xf32>
    %85 = vector.shape_cast %84 : vector<16x16xf32> to vector<2x8x16xf32>
    %86 = vector.extract_strided_slice %85 {offsets = [0, 0, 0], sizes = [2, 8, 8], strides = [1, 1, 1]} : vector<2x8x16xf32> to vector<2x8x8xf32>
    %cst_42 = arith.constant dense<0xFF800000> : vector<2x8xf32>
    %87 = vector.multi_reduction <maximumf>, %86, %cst_42 [1] : vector<2x8x8xf32> to vector<2x8xf32>
    %88 = vector.shape_cast %87 : vector<2x8xf32> to vector<2x1x8xf32>
    %89 = vector.broadcast %88 : vector<2x1x8xf32> to vector<2x8x8xf32>
    %90 = arith.subf %86, %89 : vector<2x8x8xf32>
    %91 = math.exp %90 : vector<2x8x8xf32>
    %cst_43 = arith.constant dense<0.000000e+00> : vector<2x8xf32>
    %92 = vector.multi_reduction <add>, %91, %cst_43 [1] : vector<2x8x8xf32> to vector<2x8xf32>
    %93 = vector.shape_cast %92 : vector<2x8xf32> to vector<2x1x8xf32>
    %94 = tpu.reciprocal %93 {approx = true} : vector<2x1x8xf32> -> vector<2x1x8xf32>
    %95 = vector.broadcast %94 : vector<2x1x8xf32> to vector<2x8x8xf32>
    %96 = arith.mulf %91, %95 : vector<2x8x8xf32>
    %cst_44 = arith.constant dense<0.000000e+00> : vector<2x8xf32>
    %97 = vector.multi_reduction <add>, %96, %cst_44 [2] : vector<2x8x8xf32> to vector<2x8xf32>
    %98 = vector.shape_cast %97 : vector<2x8xf32> to vector<2x8x1xf32>
    %cst_45 = arith.constant 8.000000e+00 : f32
    %99 = vector.broadcast %cst_45 : f32 to vector<2x8x1xf32>
    %100 = arith.divf %98, %99 : vector<2x8x1xf32>
    %101 = vector.broadcast %100 : vector<2x8x1xf32> to vector<2x8x32xf32>
    %102 = arith.mulf %101, %74 : vector<2x8x32xf32>
    %cst_46 = arith.constant dense<0.000000e+00> : vector<2x32xf32>
    %103 = vector.multi_reduction <add>, %102, %cst_46 [1] : vector<2x8x32xf32> to vector<2x32xf32>
    %104 = tpu.concatenate %3, %103 in 1 : vector<2x32xf32>, vector<2x32xf32> -> vector<2x64xf32>
    %c1_47 = arith.constant 1 : index
    %c0_48 = arith.constant 0 : index
    %c0_49 = arith.constant 0 : index
    %105 = vector.load %arg3[%c1_47, %c0_48, %c0_49] : memref<3x64x128xbf16, #tpu.memory_space<vmem>>, vector<1x64x128xbf16>
    %106 = vector.shape_cast %105 : vector<1x64x128xbf16> to vector<64x128xbf16>
    %107 = arith.truncf %104 : vector<2x64xf32> to vector<2x64xbf16>
    %cst_50 = arith.constant dense<0.000000e+00> : vector<2x128xf32>
    %108 = tpu.matmul %107, %106, %cst_50 {dimension_numbers = #tpu.dot_dimension_numbers<[1], [0], [0], [1], [0, 0, 1, 1], [], []>} : vector<2x64xbf16>, vector<64x128xbf16>, vector<2x128xf32> -> vector<2x128xf32>
    %c1_51 = arith.constant 1 : index
    %c0_52 = arith.constant 0 : index
    %c0_53 = arith.constant 0 : index
    %109 = vector.load %arg4[%c1_51, %c0_52, %c0_53] : memref<3x1x128xf32, #tpu.memory_space<vmem>>, vector<1x1x128xf32>
    %110 = vector.shape_cast %109 : vector<1x1x128xf32> to vector<1x128xf32>
    %111 = vector.broadcast %110 : vector<1x128xf32> to vector<2x128xf32>
    %112 = arith.addf %108, %111 : vector<2x128xf32>
    %c1_54 = arith.constant 1 : index
    %c0_55 = arith.constant 0 : index
    %c0_56 = arith.constant 0 : index
    %113 = vector.load %arg6[%c1_54, %c0_55, %c0_56] : memref<3x128x16xbf16, #tpu.memory_space<vmem>>, vector<1x128x16xbf16>
    %114 = vector.shape_cast %113 : vector<1x128x16xbf16> to vector<128x16xbf16>
    %115 = arith.truncf %112 : vector<2x128xf32> to vector<2x128xbf16>
    %cst_57 = arith.constant dense<0.000000e+00> : vector<2x16xf32>
    %116 = tpu.matmul %115, %114, %cst_57 {dimension_numbers = #tpu.dot_dimension_numbers<[1], [0], [0], [1], [0, 0, 1, 1], [], []>} : vector<2x128xbf16>, vector<128x16xbf16>, vector<2x16xf32> -> vector<2x16xf32>
    %c1_58 = arith.constant 1 : index
    %c0_59 = arith.constant 0 : index
    %c0_60 = arith.constant 0 : index
    %117 = vector.load %arg7[%c1_58, %c0_59, %c0_60] : memref<3x1x16xf32, #tpu.memory_space<vmem>>, vector<1x1x16xf32>
    %118 = vector.shape_cast %117 : vector<1x1x16xf32> to vector<1x16xf32>
    %119 = vector.broadcast %118 : vector<1x16xf32> to vector<2x16xf32>
    %120 = arith.addf %116, %119 : vector<2x16xf32>
    %121 = vector.extract_strided_slice %120 {offsets = [0, 0], sizes = [2, 8], strides = [1, 1]} : vector<2x16xf32> to vector<2x8xf32>
    %122 = arith.negf %121 : vector<2x8xf32>
    %123 = math.exp %122 : vector<2x8xf32>
    %cst_61 = arith.constant 1.000000e+00 : f32
    %124 = vector.broadcast %cst_61 : f32 to vector<2x8xf32>
    %125 = arith.addf %124, %123 : vector<2x8xf32>
    %126 = arith.divf %124, %125 : vector<2x8xf32>
    %127 = vector.shape_cast %126 : vector<2x8xf32> to vector<2x1x8xf32>
    %128 = vector.broadcast %127 : vector<2x1x8xf32> to vector<2x8x8xf32>
    %129 = arith.mulf %96, %128 : vector<2x8x8xf32>
    %cst_62 = arith.constant dense<0xFF800000> : vector<2x8xf32>
    %130 = vector.multi_reduction <maximumf>, %129, %cst_62 [1] : vector<2x8x8xf32> to vector<2x8xf32>
    %131 = vector.shape_cast %130 : vector<2x8xf32> to vector<2x1x8xf32>
    %132 = vector.broadcast %131 : vector<2x1x8xf32> to vector<2x8x8xf32>
    %133 = arith.subf %129, %132 : vector<2x8x8xf32>
    %134 = math.exp %133 : vector<2x8x8xf32>
    %cst_63 = arith.constant dense<0.000000e+00> : vector<2x8xf32>
    %135 = vector.multi_reduction <add>, %134, %cst_63 [1] : vector<2x8x8xf32> to vector<2x8xf32>
    %136 = vector.shape_cast %135 : vector<2x8xf32> to vector<2x1x8xf32>
    %137 = tpu.reciprocal %136 {approx = true} : vector<2x1x8xf32> -> vector<2x1x8xf32>
    %138 = vector.broadcast %137 : vector<2x1x8xf32> to vector<2x8x8xf32>
    %139 = arith.mulf %134, %138 : vector<2x8x8xf32>
    %cst_64 = arith.constant dense<0.000000e+00> : vector<2x8xf32>
    %140 = vector.multi_reduction <add>, %139, %cst_64 [2] : vector<2x8x8xf32> to vector<2x8xf32>
    %cst_65 = arith.constant 8.000000e+00 : f32
    %141 = vector.broadcast %cst_65 : f32 to vector<2x8xf32>
    %142 = arith.divf %140, %141 : vector<2x8xf32>
    %143 = vector.shape_cast %142 : vector<2x8xf32> to vector<2x8x1xf32>
    %144 = vector.broadcast %143 : vector<2x8x1xf32> to vector<2x8x32xf32>
    %145 = arith.mulf %0, %144 : vector<2x8x32xf32>
    %146 = vector.shape_cast %145 : vector<2x8x32xf32> to vector<16x32xf32>
    %c2 = arith.constant 2 : index
    %c0_66 = arith.constant 0 : index
    %c0_67 = arith.constant 0 : index
    %147 = vector.load %arg2[%c2, %c0_66, %c0_67] : memref<3x32x64xbf16, #tpu.memory_space<vmem>>, vector<1x32x64xbf16>
    %148 = vector.shape_cast %147 : vector<1x32x64xbf16> to vector<32x64xbf16>
    %149 = arith.truncf %146 : vector<16x32xf32> to vector<16x32xbf16>
    %cst_68 = arith.constant dense<0.000000e+00> : vector<16x64xf32>
    %150 = tpu.matmul %149, %148, %cst_68 {dimension_numbers = #tpu.dot_dimension_numbers<[1], [0], [0], [1], [0, 0, 1, 1], [], []>} : vector<16x32xbf16>, vector<32x64xbf16>, vector<16x64xf32> -> vector<16x64xf32>
    %151 = math.tanh %150 : vector<16x64xf32>
    %c2_69 = arith.constant 2 : index
    %c0_70 = arith.constant 0 : index
    %c0_71 = arith.constant 0 : index
    %152 = vector.load %arg5[%c2_69, %c0_70, %c0_71] : memref<3x64x16xbf16, #tpu.memory_space<vmem>>, vector<1x64x16xbf16>
    %153 = vector.shape_cast %152 : vector<1x64x16xbf16> to vector<64x16xbf16>
    %154 = arith.truncf %151 : vector<16x64xf32> to vector<16x64xbf16>
    %cst_72 = arith.constant dense<0.000000e+00> : vector<16x16xf32>
    %155 = tpu.matmul %154, %153, %cst_72 {dimension_numbers = #tpu.dot_dimension_numbers<[1], [0], [0], [1], [0, 0, 1, 1], [], []>} : vector<16x64xbf16>, vector<64x16xbf16>, vector<16x16xf32> -> vector<16x16xf32>
    %156 = vector.shape_cast %155 : vector<16x16xf32> to vector<2x8x16xf32>
    %cst_73 = arith.constant dense<0xFF800000> : vector<2x16xf32>
    %157 = vector.multi_reduction <maximumf>, %156, %cst_73 [1] : vector<2x8x16xf32> to vector<2x16xf32>
    %158 = vector.shape_cast %157 : vector<2x16xf32> to vector<2x1x16xf32>
    %159 = vector.broadcast %158 : vector<2x1x16xf32> to vector<2x8x16xf32>
    %160 = arith.subf %156, %159 : vector<2x8x16xf32>
    %161 = math.exp %160 : vector<2x8x16xf32>
    %cst_74 = arith.constant dense<0.000000e+00> : vector<2x16xf32>
    %162 = vector.multi_reduction <add>, %161, %cst_74 [1] : vector<2x8x16xf32> to vector<2x16xf32>
    %163 = vector.shape_cast %162 : vector<2x16xf32> to vector<2x1x16xf32>
    %164 = tpu.reciprocal %163 {approx = true} : vector<2x1x16xf32> -> vector<2x1x16xf32>
    %165 = vector.broadcast %164 : vector<2x1x16xf32> to vector<2x8x16xf32>
    %166 = arith.mulf %161, %165 : vector<2x8x16xf32>
    %cst_75 = arith.constant dense<0.000000e+00> : vector<2x8xf32>
    %167 = vector.multi_reduction <add>, %166, %cst_75 [2] : vector<2x8x16xf32> to vector<2x8xf32>
    %168 = vector.shape_cast %167 : vector<2x8xf32> to vector<2x8x1xf32>
    %cst_76 = arith.constant 1.600000e+01 : f32
    %169 = vector.broadcast %cst_76 : f32 to vector<2x8x1xf32>
    %170 = arith.divf %168, %169 : vector<2x8x1xf32>
    %171 = vector.broadcast %170 : vector<2x8x1xf32> to vector<2x8x32xf32>
    %172 = arith.mulf %171, %145 : vector<2x8x32xf32>
    %cst_77 = arith.constant dense<0.000000e+00> : vector<2x32xf32>
    %173 = vector.multi_reduction <add>, %172, %cst_77 [1] : vector<2x8x32xf32> to vector<2x32xf32>
    %174 = tpu.concatenate %3, %173 in 1 : vector<2x32xf32>, vector<2x32xf32> -> vector<2x64xf32>
    %c2_78 = arith.constant 2 : index
    %c0_79 = arith.constant 0 : index
    %c0_80 = arith.constant 0 : index
    %175 = vector.load %arg3[%c2_78, %c0_79, %c0_80] : memref<3x64x128xbf16, #tpu.memory_space<vmem>>, vector<1x64x128xbf16>
    %176 = vector.shape_cast %175 : vector<1x64x128xbf16> to vector<64x128xbf16>
    %177 = arith.truncf %174 : vector<2x64xf32> to vector<2x64xbf16>
    %cst_81 = arith.constant dense<0.000000e+00> : vector<2x128xf32>
    %178 = tpu.matmul %177, %176, %cst_81 {dimension_numbers = #tpu.dot_dimension_numbers<[1], [0], [0], [1], [0, 0, 1, 1], [], []>} : vector<2x64xbf16>, vector<64x128xbf16>, vector<2x128xf32> -> vector<2x128xf32>
    %c2_82 = arith.constant 2 : index
    %c0_83 = arith.constant 0 : index
    %c0_84 = arith.constant 0 : index
    %179 = vector.load %arg4[%c2_82, %c0_83, %c0_84] : memref<3x1x128xf32, #tpu.memory_space<vmem>>, vector<1x1x128xf32>
    %180 = vector.shape_cast %179 : vector<1x1x128xf32> to vector<1x128xf32>
    %181 = vector.broadcast %180 : vector<1x128xf32> to vector<2x128xf32>
    %182 = arith.addf %178, %181 : vector<2x128xf32>
    %c2_85 = arith.constant 2 : index
    %c0_86 = arith.constant 0 : index
    %c0_87 = arith.constant 0 : index
    %183 = vector.load %arg6[%c2_85, %c0_86, %c0_87] : memref<3x128x16xbf16, #tpu.memory_space<vmem>>, vector<1x128x16xbf16>
    %184 = vector.shape_cast %183 : vector<1x128x16xbf16> to vector<128x16xbf16>
    %185 = arith.truncf %182 : vector<2x128xf32> to vector<2x128xbf16>
    %cst_88 = arith.constant dense<0.000000e+00> : vector<2x16xf32>
    %186 = tpu.matmul %185, %184, %cst_88 {dimension_numbers = #tpu.dot_dimension_numbers<[1], [0], [0], [1], [0, 0, 1, 1], [], []>} : vector<2x128xbf16>, vector<128x16xbf16>, vector<2x16xf32> -> vector<2x16xf32>
    %c2_89 = arith.constant 2 : index
    %c0_90 = arith.constant 0 : index
    %c0_91 = arith.constant 0 : index
    %187 = vector.load %arg7[%c2_89, %c0_90, %c0_91] : memref<3x1x16xf32, #tpu.memory_space<vmem>>, vector<1x1x16xf32>
    %188 = vector.shape_cast %187 : vector<1x1x16xf32> to vector<1x16xf32>
    %189 = vector.broadcast %188 : vector<1x16xf32> to vector<2x16xf32>
    %190 = arith.addf %186, %189 : vector<2x16xf32>
    %191 = arith.negf %190 : vector<2x16xf32>
    %192 = math.exp %191 : vector<2x16xf32>
    %cst_92 = arith.constant 1.000000e+00 : f32
    %193 = vector.broadcast %cst_92 : f32 to vector<2x16xf32>
    %194 = arith.addf %193, %192 : vector<2x16xf32>
    %195 = arith.divf %193, %194 : vector<2x16xf32>
    %196 = vector.shape_cast %195 : vector<2x16xf32> to vector<2x1x16xf32>
    %197 = vector.broadcast %196 : vector<2x1x16xf32> to vector<2x8x16xf32>
    %198 = arith.mulf %166, %197 : vector<2x8x16xf32>
    %cst_93 = arith.constant dense<0xFF800000> : vector<2x16xf32>
    %199 = vector.multi_reduction <maximumf>, %198, %cst_93 [1] : vector<2x8x16xf32> to vector<2x16xf32>
    %200 = vector.shape_cast %199 : vector<2x16xf32> to vector<2x1x16xf32>
    %201 = vector.broadcast %200 : vector<2x1x16xf32> to vector<2x8x16xf32>
    %202 = arith.subf %198, %201 : vector<2x8x16xf32>
    %203 = math.exp %202 : vector<2x8x16xf32>
    %cst_94 = arith.constant dense<0.000000e+00> : vector<2x16xf32>
    %204 = vector.multi_reduction <add>, %203, %cst_94 [1] : vector<2x8x16xf32> to vector<2x16xf32>
    %205 = vector.shape_cast %204 : vector<2x16xf32> to vector<2x1x16xf32>
    %206 = tpu.reciprocal %205 {approx = true} : vector<2x1x16xf32> -> vector<2x1x16xf32>
    %207 = vector.broadcast %206 : vector<2x1x16xf32> to vector<2x8x16xf32>
    %208 = arith.mulf %203, %207 : vector<2x8x16xf32>
    %cst_95 = arith.constant dense<0.000000e+00> : vector<2x8xf32>
    %209 = vector.multi_reduction <add>, %208, %cst_95 [2] : vector<2x8x16xf32> to vector<2x8xf32>
    %cst_96 = arith.constant 1.600000e+01 : f32
    %210 = vector.broadcast %cst_96 : f32 to vector<2x8xf32>
    %211 = arith.divf %209, %210 : vector<2x8xf32>
    %212 = tpu.concatenate %41, %112, %182 in 1 : vector<2x128xf32>, vector<2x128xf32>, vector<2x128xf32> -> vector<2x384xf32>
    %c0_97 = arith.constant 0 : index
    %c0_98 = arith.constant 0 : index
    %213 = vector.load %arg8[%c0_97, %c0_98] : memref<384x128xbf16, #tpu.memory_space<vmem>>, vector<384x128xbf16>
    %214 = arith.truncf %212 : vector<2x384xf32> to vector<2x384xbf16>
    %cst_99 = arith.constant dense<0.000000e+00> : vector<2x128xf32>
    %215 = tpu.matmul %214, %213, %cst_99 {dimension_numbers = #tpu.dot_dimension_numbers<[1], [0], [0], [1], [0, 0, 1, 1], [], []>} : vector<2x384xbf16>, vector<384x128xbf16>, vector<2x128xf32> -> vector<2x128xf32>
    %c0_100 = arith.constant 0 : index
    %c0_101 = arith.constant 0 : index
    %216 = vector.load %arg9[%c0_100, %c0_101] : memref<1x128xf32, #tpu.memory_space<vmem>>, vector<1x128xf32>
    %217 = vector.broadcast %216 : vector<1x128xf32> to vector<2x128xf32>
    %218 = arith.addf %215, %217 : vector<2x128xf32>
    %c0_102 = arith.constant 0 : index
    %c0_103 = arith.constant 0 : index
    %219 = vector.load %arg10[%c0_102, %c0_103] : memref<128x256xbf16, #tpu.memory_space<vmem>>, vector<128x256xbf16>
    %220 = arith.truncf %218 : vector<2x128xf32> to vector<2x128xbf16>
    %cst_104 = arith.constant dense<0.000000e+00> : vector<2x256xf32>
    %221 = tpu.matmul %220, %219, %cst_104 {dimension_numbers = #tpu.dot_dimension_numbers<[1], [0], [0], [1], [0, 0, 1, 1], [], []>} : vector<2x128xbf16>, vector<128x256xbf16>, vector<2x256xf32> -> vector<2x256xf32>
    %c0_105 = arith.constant 0 : index
    %c0_106 = arith.constant 0 : index
    %222 = vector.load %arg11[%c0_105, %c0_106] : memref<1x256xf32, #tpu.memory_space<vmem>>, vector<1x256xf32>
    %223 = vector.broadcast %222 : vector<1x256xf32> to vector<2x256xf32>
    %224 = arith.addf %221, %223 : vector<2x256xf32>
    %225 = vector.extract_strided_slice %224 {offsets = [0, 0], sizes = [2, 128], strides = [1, 1]} : vector<2x256xf32> to vector<2x128xf32>
    %cst_107 = arith.constant 0.000000e+00 : f32
    %226 = vector.broadcast %cst_107 : f32 to vector<2x128xf32>
    %227 = arith.maximumf %225, %226 : vector<2x128xf32>
    %228 = vector.extract_strided_slice %224 {offsets = [0, 128], sizes = [2, 128], strides = [1, 1]} : vector<2x256xf32> to vector<2x128xf32>
    %229 = arith.negf %228 : vector<2x128xf32>
    %230 = math.exp %229 : vector<2x128xf32>
    %cst_108 = arith.constant 1.000000e+00 : f32
    %231 = vector.broadcast %cst_108 : f32 to vector<2x128xf32>
    %232 = arith.addf %231, %230 : vector<2x128xf32>
    %233 = arith.divf %231, %232 : vector<2x128xf32>
    %234 = arith.mulf %227, %233 : vector<2x128xf32>
    %cst_109 = arith.constant 1.000000e+00 : f32
    %235 = vector.broadcast %cst_109 : f32 to vector<2x128xf32>
    %236 = arith.subf %235, %233 : vector<2x128xf32>
    %237 = arith.mulf %236, %218 : vector<2x128xf32>
    %238 = arith.addf %234, %237 : vector<2x128xf32>
    %c0_110 = arith.constant 0 : index
    %c0_111 = arith.constant 0 : index
    %239 = vector.load %arg12[%c0_110, %c0_111] : memref<128x32xbf16, #tpu.memory_space<vmem>>, vector<128x32xbf16>
    %240 = arith.truncf %238 : vector<2x128xf32> to vector<2x128xbf16>
    %cst_112 = arith.constant dense<0.000000e+00> : vector<2x32xf32>
    %241 = tpu.matmul %240, %239, %cst_112 {dimension_numbers = #tpu.dot_dimension_numbers<[1], [0], [0], [1], [0, 0, 1, 1], [], []>} : vector<2x128xbf16>, vector<128x32xbf16>, vector<2x32xf32> -> vector<2x32xf32>
    %c0_113 = arith.constant 0 : index
    %c0_114 = arith.constant 0 : index
    %242 = vector.load %arg13[%c0_113, %c0_114] : memref<1x32xf32, #tpu.memory_space<vmem>>, vector<1x32xf32>
    %243 = vector.broadcast %242 : vector<1x32xf32> to vector<2x32xf32>
    %244 = arith.addf %241, %243 : vector<2x32xf32>
    %245 = arith.negf %244 : vector<2x32xf32>
    %246 = math.exp %245 : vector<2x32xf32>
    %cst_115 = arith.constant 1.000000e+00 : f32
    %247 = vector.broadcast %cst_115 : f32 to vector<2x32xf32>
    %248 = arith.addf %247, %246 : vector<2x32xf32>
    %249 = arith.divf %247, %248 : vector<2x32xf32>
    %250 = tpu.concatenate %55, %126, %195 in 1 : vector<2x8xf32>, vector<2x8xf32>, vector<2x16xf32> -> vector<2x32xf32>
    %cst_116 = arith.constant 5.000000e-01 : f32
    %251 = vector.broadcast %cst_116 : f32 to vector<2x32xf32>
    %252 = arith.mulf %251, %249 : vector<2x32xf32>
    %cst_117 = arith.constant 5.000000e-01 : f32
    %253 = vector.broadcast %cst_117 : f32 to vector<2x32xf32>
    %254 = arith.mulf %253, %250 : vector<2x32xf32>
    %255 = arith.addf %252, %254 : vector<2x32xf32>
    %256 = vector.shape_cast %25 : vector<2x8x8xf32> to vector<2x64xf32>
    %cst_118 = arith.constant 0.000000e+00 : f32
    %257 = vector.broadcast %cst_118 : f32 to vector<2x56xf32>
    %258 = tpu.concatenate %255, %244, %71, %142, %211, %50, %121, %190, %55, %126, %256, %257 in 1 : vector<2x32xf32>, vector<2x32xf32>, vector<2x8xf32>, vector<2x8xf32>, vector<2x8xf32>, vector<2x8xf32>, vector<2x8xf32>, vector<2x16xf32>, vector<2x8xf32>, vector<2x8xf32>, vector<2x64xf32>, vector<2x56xf32> -> vector<2x256xf32>
    %c0_119 = arith.constant 0 : index
    %c0_120 = arith.constant 0 : index
    %259 = vector.load %arg14[%c0_119, %c0_120] : memref<2x256xf32, #tpu.memory_space<vmem>>, vector<2x256xf32>
    tpu.vector_store %arg14[%c0_119, %c0_120], %258 {strides = array<i32>} : memref<2x256xf32, #tpu.memory_space<vmem>>, vector<2x256xf32>,
    return
  }
  func.func @transform_0(%arg0: i32) -> (i32, i32, i32) {
    %c0_i32 = arith.constant 0 : i32
    %c0_i32_0 = arith.constant 0 : i32
    %c0_i32_1 = arith.constant 0 : i32
    return %arg0, %c0_i32, %c0_i32_0 : i32, i32, i32
  }
  func.func @transform_1(%arg0: i32) -> (i32, i32, i32) {
    %c0_i32 = arith.constant 0 : i32
    %c0_i32_0 = arith.constant 0 : i32
    %c0_i32_1 = arith.constant 0 : i32
    %c0_i32_2 = arith.constant 0 : i32
    return %c0_i32, %c0_i32_0, %c0_i32_1 : i32, i32, i32
  }
  func.func @transform_2(%arg0: i32) -> (i32, i32, i32) {
    %c0_i32 = arith.constant 0 : i32
    %c0_i32_0 = arith.constant 0 : i32
    %c0_i32_1 = arith.constant 0 : i32
    %c0_i32_2 = arith.constant 0 : i32
    return %c0_i32, %c0_i32_0, %c0_i32_1 : i32, i32, i32
  }
  func.func @transform_3(%arg0: i32) -> (i32, i32, i32) {
    %c0_i32 = arith.constant 0 : i32
    %c0_i32_0 = arith.constant 0 : i32
    %c0_i32_1 = arith.constant 0 : i32
    %c0_i32_2 = arith.constant 0 : i32
    return %c0_i32, %c0_i32_0, %c0_i32_1 : i32, i32, i32
  }
  func.func @transform_4(%arg0: i32) -> (i32, i32, i32) {
    %c0_i32 = arith.constant 0 : i32
    %c0_i32_0 = arith.constant 0 : i32
    %c0_i32_1 = arith.constant 0 : i32
    %c0_i32_2 = arith.constant 0 : i32
    return %c0_i32, %c0_i32_0, %c0_i32_1 : i32, i32, i32
  }
  func.func @transform_5(%arg0: i32) -> (i32, i32, i32) {
    %c0_i32 = arith.constant 0 : i32
    %c0_i32_0 = arith.constant 0 : i32
    %c0_i32_1 = arith.constant 0 : i32
    %c0_i32_2 = arith.constant 0 : i32
    return %c0_i32, %c0_i32_0, %c0_i32_1 : i32, i32, i32
  }
  func.func @transform_6(%arg0: i32) -> (i32, i32, i32) {
    %c0_i32 = arith.constant 0 : i32
    %c0_i32_0 = arith.constant 0 : i32
    %c0_i32_1 = arith.constant 0 : i32
    %c0_i32_2 = arith.constant 0 : i32
    return %c0_i32, %c0_i32_0, %c0_i32_1 : i32, i32, i32
  }
  func.func @transform_7(%arg0: i32) -> (i32, i32) {
    %c0_i32 = arith.constant 0 : i32
    %c0_i32_0 = arith.constant 0 : i32
    %c0_i32_1 = arith.constant 0 : i32
    return %c0_i32, %c0_i32_0 : i32, i32
  }
  func.func @transform_8(%arg0: i32) -> (i32, i32) {
    %c0_i32 = arith.constant 0 : i32
    %c0_i32_0 = arith.constant 0 : i32
    %c0_i32_1 = arith.constant 0 : i32
    return %c0_i32, %c0_i32_0 : i32, i32
  }
  func.func @transform_9(%arg0: i32) -> (i32, i32) {
    %c0_i32 = arith.constant 0 : i32
    %c0_i32_0 = arith.constant 0 : i32
    %c0_i32_1 = arith.constant 0 : i32
    return %c0_i32, %c0_i32_0 : i32, i32
  }
  func.func @transform_10(%arg0: i32) -> (i32, i32) {
    %c0_i32 = arith.constant 0 : i32
    %c0_i32_0 = arith.constant 0 : i32
    %c0_i32_1 = arith.constant 0 : i32
    return %c0_i32, %c0_i32_0 : i32, i32
  }
  func.func @transform_11(%arg0: i32) -> (i32, i32) {
    %c0_i32 = arith.constant 0 : i32
    %c0_i32_0 = arith.constant 0 : i32
    %c0_i32_1 = arith.constant 0 : i32
    return %c0_i32, %c0_i32_0 : i32, i32
  }
  func.func @transform_12(%arg0: i32) -> (i32, i32) {
    %c0_i32 = arith.constant 0 : i32
    %c0_i32_0 = arith.constant 0 : i32
    %c0_i32_1 = arith.constant 0 : i32
    return %c0_i32, %c0_i32_0 : i32, i32
  }
  func.func @transform_13(%arg0: i32) -> (i32, i32) {
    %c0_i32 = arith.constant 0 : i32
    %c0_i32_0 = arith.constant 0 : i32
    return %arg0, %c0_i32 : i32, i32
  }
}

</mosaic_0001>

<bundles_post_ra>
// kernel: tpu_custom_call.1
= control target key start
LH: loop header
LB: loop body
LE: loop exit
PB: predicated region body
PF: predicated region fallthrough
CT: control target
= control target key end

     0   :  { %18 = vsyncpa [#allocation3], 0  ;;  %s3992_s0 = inlined_call_operand.hbm [shape: f32[2,8,32], index: 0, kind: input, shape index: {}]   ;;  %s3993_s1 = inlined_call_operand.hbm [shape: bf16[3,32,64], index: 1, kind: input, shape index: {}]   ;;  %s3994_s2 = inlined_call_operand.vmem [shape: bf16[3,64,128], index: 2, kind: input, shape index: {}]   ;;  %s3995_s3 = inlined_call_operand.vmem [shape: f32[3,1,128], index: 3, kind: input, shape index: {}]   ;;  %s3996_s4 = inlined_call_operand.vmem [shape: bf16[3,64,16], index: 4, kind: input, shape index: {}]   ;;  %s3997_s5 = inlined_call_operand.vmem [shape: bf16[3,128,16], index: 5, kind: input, shape index: {}]   ;;  %s3998_s6 = inlined_call_operand.hbm [shape: f32[3,1,16], index: 6, kind: input, shape index: {}]   ;;  %s3999_s7 = inlined_call_operand.vmem [shape: bf16[384,128], index: 7, kind: input, shape index: {}]   ;;  %s4000_s8 = inlined_call_operand.vmem [shape: f32[1,128], index: 8, kind: input, shape index: {}]   ;;  %s4001_s9 = inlined_call_operand.vmem [shape: bf16[128,256], index: 9, kind: input, shape index: {}]   ;;  %s4002_s10 = inlined_call_operand.hbm [shape: f32[1,256], index: 10, kind: input, shape index: {}]   ;;  %s4003_s11 = inlined_call_operand.vmem [shape: bf16[128,32], index: 11, kind: input, shape index: {}]   ;;  %s4004_s12 = inlined_call_operand.vmem [shape: f32[1,32], index: 12, kind: input, shape index: {}]   ;;  %s4005_s13 = inlined_call_operand.hbm [shape: f32[2,256], index: 13, kind: output, shape index: {}]  }
   0x1   :  { %19 = vsyncpa [#allocation6], 0 }
   0x2   :  { %20 = vsyncpa [#allocation9], 0 }
   0x3   :  { %21 = vsyncpa [#allocation4], 0  ;;  %s3219_s25 = smov [#allocation5]  }
   0x4   :  { %s39_s26 = sshll.u32 %s3219_s25, 4  ;;  %s40_s26 = int_to_ptr.vmem [resolvable:$true] %s39_s26 }
   0x5   :  { %s3119_s27 = scalar_lea.vmem %s40_s26, 768  ;;  %p3124_p1 = scmp.lt.s32.totalorder %s40_s26, %s40_s26 }
   0x6   :  { %p3120_p0 = scmp.ne.s32.totalorder %s40_s26, %s3119_s27  ;;  %p3125_p2 = scmp.lt.s32.totalorder %s3119_s27, %s3119_s27 }
   0x8   :  { %p3126_p3 = por %p3125_p2, %p3124_p1 }
   0xa   :  { %p3127_p4 = pnand %p3126_p3, %p3120_p0 }
   0xc   :  { %3130 = shalt.err (!%p3127_p4)
}
   0xd   :  { %s3220_s28 = smov 64   ;;  %s3221_s29 = smov 4  }
   0xe   :  { %45 = dma.hbm_to_vmem [thread:$0]  %s3993_s1, 768, %s40_s26, [#allocation6], %s3220_s28, %s3220_s28, %s3221_s29  }
   0xf   :  { %s3222_s15 = smov [#allocation2]  }
  0x10   :  { %s27_s16 = sshll.u32 %s3222_s15, 4  ;;  %s28_s16 = int_to_ptr.vmem [resolvable:$true] %s27_s16 }
  0x11   :  { %s3139_s17 = scalar_lea.vmem %s28_s16, 256  ;;  %p3144_p6 = scmp.lt.s32.totalorder %s28_s16, %s28_s16 }
  0x12   :  { %p3140_p5 = scmp.ne.s32.totalorder %s28_s16, %s3139_s17  ;;  %p3145_p7 = scmp.lt.s32.totalorder %s3139_s17, %s3139_s17 }
  0x14   :  { %p3146_p8 = por %p3145_p7, %p3144_p6 }
  0x16   :  { %p3147_p9 = pnand %p3146_p8, %p3140_p5 }
  0x18   :  { %3150 = shalt.err (!%p3147_p9)
}
  0x19   :  { %s3223_s18 = smov 128   ;;  %s3224_s19 = smov 8  }
  0x1a   :  { %33 = dma.hbm_to_vmem [thread:$0]  %s3992_s0, 256, %s28_s16, [#allocation3], %s3223_s18, %s3223_s18, %s3224_s19  }
  0x1b   :  { %s3225_s22 = smov [#allocation7]  }
  0x1c   :  { %s59_s23 = sshll.u32 %s3225_s22, 4  ;;  %s60_s23 = int_to_ptr.vmem [resolvable:$true] %s59_s23 }
  0x1d   :  { %s3159_s1 = scalar_lea.vmem %s60_s23, 48  ;;  %s3163_s24 = scalar_lea.vmem %s60_s23, 64 }
  0x1e   :  { %p3160_p10 = scmp.ne.s32.totalorder %s60_s23, %s3159_s1  ;;  %p3164_p11 = scmp.lt.s32.totalorder %s60_s23, %s60_s23 }
  0x1f   :  { %p3165_p12 = scmp.lt.s32.totalorder %s3163_s24, %s3159_s1 }
  0x21   :  { %p3166_p13 = por %p3165_p12, %p3164_p11 }
  0x23   :  { %p3167_p0 = pnand %p3166_p13, %p3160_p10 }
  0x25   :  { %3170 = shalt.err (!%p3167_p0)
}
  0x26   :  { %s3226_s25 = smov 16   ;;  %s3227_s26 = smov 1  }
  0x27   :  { %65 = dma.hbm_to_vmem [thread:$0]  %s3998_s6, 48, %s60_s23, [#allocation6], %s3226_s25, %s3226_s25, %s3227_s26  }
  0x28   :  { %s3228_s0 = smov [#allocation8]  }
  0x29   :  { %s78_s29 = sshll.u32 %s3228_s0, 4  ;;  %s79_s29 = int_to_ptr.vmem [resolvable:$true] %s78_s29 }
  0x2a   :  { %s3179_s30 = scalar_lea.vmem %s79_s29, 32  ;;  %p3184_p2 = scmp.lt.s32.totalorder %s79_s29, %s79_s29 }
  0x2b   :  { %p3180_p1 = scmp.ne.s32.totalorder %s79_s29, %s3179_s30  ;;  %p3185_p3 = scmp.lt.s32.totalorder %s3179_s30, %s3179_s30 }
  0x2d   :  { %p3186_p4 = por %p3185_p3, %p3184_p2 }
  0x2f   :  { %p3187_p5 = pnand %p3186_p4, %p3180_p1 }
  0x31   :  { %3190 = shalt.err (!%p3187_p5)
}
  0x32   :  { %81 = dma.hbm_to_vmem [thread:$0]  %s4002_s10, 32, %s79_s29, [#allocation9]  }
  0x33   :  { %3211 = dma.done.wait [#allocation3], 256  }
  0x34   :  { %3212 = vsyncadd [#allocation3], 4294967040 }
  0x35   :  { %3213 = dma.done.wait [#allocation6], 816  }
  0x36   :  { %3214 = vsyncadd [#allocation6], 4294966480 }
  0x37   :  { %3215 = dma.done.wait [#allocation9], 32  }
  0x38   :  { %3216 = vsyncadd [#allocation9], 4294967264  ;;  %v3229_v0 = vmov 0.0   ;;  %vm3230_vm0 = vmmov 0   ;;  %v2919_v1 = vld [vmem:[#allocation5 + $0x8] sm:$0xff]   ;;  %v2920_v2 = vld [vmem:[#allocation5] sm:$0xff]   ;;  %v540_v55 = vlaneseq }
  0x39   :  { %2697 = vmatprep.subr.bf16.mxu1 %v3229_v0  ;;  %2701 = vmatprep.mubr.msk.bf16.mxu1 %vm3230_vm0, %v3229_v0  ;;  %v3336_v3 = vld [vmem:[#allocation2] sm:$0xff]  ;;  %v3338_v4 = vld [vmem:[#allocation2 + $0x8] sm:$0xff]  ;;  %vm101_vm1 = vcmask 261120   ;;  %v2921_v6 = vld [vmem:[%s3996_s4 + $0x18] sm:$0xff]   ;;  %vm215_vm2 = vcmask 523264   ;;  %vm260_vm3 = vcmask 64512  }
  0x3a   :  { %2717 = vmatprep.subr.bf16.mxu0 %v3229_v0  ;;  %2725 = vmatprep.mubr.msk.bf16.mxu0 %vm3230_vm0, %v3229_v0  ;;  %v123_v5 = vpack.c.bf16 %v3338_v4, %v3336_v3  ;;  %v2922_v7 = vld [vmem:[%s3996_s4 + $0x10] sm:$0xff]   ;;  %v2923_v8 = vld [vmem:[%s3996_s4 + $0x8] sm:$0xff]   ;;  %v2924_v9 = vld [vmem:[%s3996_s4] sm:$0xff]   ;;  %v3231_v56 = vmov 1983009808   ;;  %v3371_v60 = vshrl.u32 %v540_v55, 7 }
  0x3b   :  { %2698 = vmatpush3.bf16.msra.mxu1 %v2919_v1  ;;  %v2188_v57 = vunpack.c.l.s4 %v3231_v56  ;;  %v3232_v58 = vmov 1934713408   ;;  %vm325_vm4 = vcmask 1041409   ;;  %s3233_s17 = smov 32   ;;  %v102_v56 = vsel %vm101_vm1, %v3336_v3, 0.0  ;;  %s3235_s0 = smov 88  }
  0x3c   :  { %2699 = vmatprep.subr.bf16.mxu1 %v3229_v0  ;;  %v2219_v59 = vunpack.c.l.s4 %v3232_v58  ;;  %v103_v58 = vrot.slane %v102_v56, 4  ;;  %vm1260_vm5 = vcmask 130048   ;;  %s3236_s28 = smov 24   ;;  %s3238_s29 = smov 48   ;;  %vm2282_vm6 = vcmask 195584  }
  0x3d   :  { %v2189_v61 = vunpack.c.0.s8 %v2188_v57  ;;  %s3239_s15 = smov 56   ;;  %s3242_s14 = smov 120   ;;  %vm2285_vm7 = vcmask 326656   ;;  %vm2287_vm8 = vcmask 392192   ;;  %vm2289_vm9 = vcmask 457728  }
  0x3e   :  { %v2220_v1 = vunpack.c.0.s8 %v2219_v59  ;;  %vm2357_vm10 = vcmask 588800   ;;  %vm2359_vm11 = vcmask 654336   ;;  %vm2361_vm12 = vcmask 719872  }
  0x3f   :  { %2700 = vmatpush3.bf16.msra.mxu1 %v2920_v2  ;;  %vm2363_vm13 = vcmask 785408   ;;  %vm2365_vm14 = vcmask 850944   ;;  %vm2367_vm15 = vcmask 982016  }
  0x40   :  { %2705 = vmatprep.subr.bf16.mxu1 %v3229_v0 }
  0x42   :  { %2702 = vmatmul.mubr.msk.bf16.vlgmr.msra.gmra.mxu1 %vm101_vm1, %v123_v5  ;;  %v2192_v5 = vsub.s32 %v2189_v61, %v3371_v60  ;;  %v104_v61 = vadd.f32 %v103_v58, %v102_v56 }
  0x43   :  { %2713 = vmatprep.mubr.msk.bf16.mxu1 %vm3230_vm0, %v3229_v0  ;;  %2706 = vmatpush3.bf16.msra.mxu1 %v2921_v6 }
  0x44   :  { %2707 = vmatprep.subr.bf16.mxu1 %v3229_v0 }
  0x47   :  { %2708 = vmatpush3.bf16.msra.mxu1 %v2922_v7 }
  0x48   :  { %2709 = vmatprep.subr.bf16.mxu1 %v3229_v0 }
  0x4b   :  { %2710 = vmatpush3.bf16.msra.mxu1 %v2923_v8 }
  0x4c   :  { %2711 = vmatprep.subr.bf16.mxu1 %v3229_v0 }
  0x4f   :  { %2712 = vmatpush3.bf16.msra.mxu1 %v2924_v9  ;;  %v3383_v9 = vsub.s32 %v2220_v1, %v3371_v60  ;;  %v105_v1 = vrot.slane %v104_v61, 2 }
  0x50   :  { %2729 = vmatprep.subr.bf16.mxu1 %v3229_v0 }
 0x102   :  { %v173_v10 = vpop.f32.mrf.mxu1 }
 0x103   :  { %3029 = vtanh.f32 %v173_v10 }
 0x104   :  { %v2703_v11 = vpop.f32.mrf.mxu1 }
 0x106   :  { %v176_v12 = vpop.f32.mrf.mxu1 }
 0x107   :  { %3031 = vtanh.f32 %v176_v12 }
 0x108   :  { %v2704_v13 = vpop.f32.mrf.mxu1 }
 0x110   :  { %v3030_v14 = vpop.eup %3029 }
 0x114   :  { %v3032_v15 = vpop.eup %3031 }
 0x115   :  { %v190_v16 = vpack.c.bf16 %v3032_v15, %v3030_v14 }
 0x117   :  { %2714 = vmatmul.mubr.msk.bf16.vlgmr.msra.gmra.mxu1 %vm215_vm2, %v190_v16 }
 0x118   :  { %2745 = vmatprep.mubr.msk.bf16.mxu1 %vm3230_vm0, %v3229_v0 }
 0x1d7   :  { %v253_v17 = vpop.f32.mrf.mxu1 }
 0x1d8   :  { %v261_v18 = vsel %vm260_vm3, %v253_v17, -inf }
 0x1d9   :  { %v262_v19 = vrot.slane %v261_v18, 4  ;;  %v2715_v20 = vpop.f32.mrf.mxu1 }
 0x1db   :  { %v263_v21 = vmax.f32 %v261_v18, %v262_v19  ;;  %v256_v22 = vpop.f32.mrf.mxu1 }
 0x1dc   :  { %v268_v23 = vsel %vm260_vm3, %v256_v22, -inf }
 0x1dd   :  { %v264_v24 = vrot.slane %v263_v21, 2  ;;  %v269_v25 = vrot.slane %v268_v23, 4  ;;  %v2716_v26 = vpop.f32.mrf.mxu1 }
 0x1df   :  { %v265_v27 = vmax.f32 %v263_v21, %v264_v24  ;;  %v270_v28 = vmax.f32 %v268_v23, %v269_v25  ;;  %v2926_v23 = vld [vmem:[%s3994_s2 + $0x10] sm:$0xff]   ;;  %v2927_v24 = vld [vmem:[%s3994_s2 + $0x8] sm:$0xff]  }
 0x1e1   :  { %v266_v29 = vrot.slane %v265_v27, 1  ;;  %v271_v30 = vrot.slane %v270_v28, 2 }
 0x1e3   :  { %v267_v31 = vmax.f32 %v265_v27, %v266_v29  ;;  %v272_v32 = vmax.f32 %v270_v28, %v271_v30 }
 0x1e5   :  { %v275_v33 = vsub.f32 %v253_v17, %v267_v31  ;;  %v273_v34 = vrot.slane %v272_v32, 1 }
 0x1e7   :  { %v277_v35 = vmul.f32 1.442695, %v275_v33  ;;  %v274_v36 = vmax.f32 %v272_v32, %v273_v34  ;;  %v2928_v34 = vld [vmem:[%s3994_s2] sm:$0xff]  }
 0x1e9   :  { %3033 = vpow2.f32 %v277_v35  ;;  %v276_v37 = vsub.f32 %v256_v22, %v274_v36  ;;  %v2925_v22 = vld [vmem:[%s3994_s2 + $0x18] sm:$0xff]  }
 0x1ea   :  { %2718 = vmatpush3.bf16.msra.mxu0 %v2925_v22 }
 0x1eb   :  { %v279_v38 = vmul.f32 1.442695, %v276_v37  ;;  %2719 = vmatprep.subr.bf16.mxu0 %v3229_v0 }
 0x1ed   :  { %3035 = vpow2.f32 %v279_v38 }
 0x1ee   :  { %2720 = vmatpush3.bf16.msra.mxu0 %v2926_v23  ;;  %v2936_v23 = vld [vmem:[%s3997_s5] sm:$0xff]  }
 0x1ef   :  { %2721 = vmatprep.subr.bf16.mxu0 %v3229_v0 }
 0x1f2   :  { %2722 = vmatpush3.bf16.msra.mxu0 %v2927_v24  ;;  %v2408_v24 = vld [vmem:[%s3995_s3] ss:$0 sm:$0xff] }
 0x1f3   :  { %2723 = vmatprep.subr.bf16.mxu0 %v3229_v0 }
 0x1f6   :  { %v3034_v39 = vpop.eup %3033  ;;  %2724 = vmatpush3.bf16.msra.mxu0 %v2928_v34 }
 0x1f7   :  { %v281_v40 = vsel %vm260_vm3, %v3034_v39, 0.0  ;;  %2749 = vmatprep.subr.bf16.mxu0 %v3229_v0 }
 0x1f8   :  { %v282_v41 = vrot.slane %v281_v40, 4 }
 0x1fa   :  { %v3036_v42 = vpop.eup %3035  ;;  %v283_v43 = vadd.f32 %v282_v41, %v281_v40  ;;  %v2929_v40 = vld [vmem:[%s3997_s5 + $0x38] sm:$0xff]  }
 0x1fb   :  { %v288_v44 = vsel %vm260_vm3, %v3036_v42, 0.0  ;;  %2730 = vmatpush3.bf16.msra.mxu1 %v2929_v40  ;;  %v3234_v40 = vmov 1966171168  }
 0x1fc   :  { %v284_v45 = vrot.slane %v283_v43, 2  ;;  %v289_v46 = vrot.slane %v288_v44, 4  ;;  %2731 = vmatprep.subr.bf16.mxu1 %v3229_v0 }
 0x1fe   :  { %v285_v47 = vadd.f32 %v284_v45, %v283_v43  ;;  %v290_v48 = vadd.f32 %v289_v46, %v288_v44  ;;  %v2931_v46 = vld [vmem:[%s3997_s5 + $0x28] sm:$0xff]  }
 0x200   :  { %v286_v49 = vrot.slane %v285_v47, 1  ;;  %v291_v50 = vrot.slane %v290_v48, 2 }
 0x202   :  { %v287_v51 = vadd.f32 %v286_v49, %v285_v47  ;;  %v292_v52 = vadd.f32 %v291_v50, %v290_v48  ;;  %v2932_v50 = vld [vmem:[%s3997_s5 + $0x20] sm:$0xff]  }
 0x204   :  { %v293_v53 = vrot.slane %v292_v52, 1  ;;  %3037 = vrcp.f32 %v287_v51  ;;  %v2933_v51 = vld [vmem:[%s3997_s5 + $0x18] sm:$0xff]  }
 0x206   :  { %v294_v54 = vadd.f32 %v293_v53, %v292_v52  ;;  %v2934_v52 = vld [vmem:[%s3997_s5 + $0x10] sm:$0xff]   ;;  %v2935_v53 = vld [vmem:[%s3997_s5 + $0x8] sm:$0xff]  }
 0x208   :  { %3039 = vrcp.f32 %v294_v54  ;;  %v109_v54 = vsel %vm101_vm1, %v3338_v4, 0.0 }
 0x209   :  { %v110_v57 = vrot.slane %v109_v54, 4 }
 0x20b   :  { %v111_v59 = vadd.f32 %v110_v57, %v109_v54 }
 0x211   :  { %v3038_v62 = vpop.eup %3037 }
 0x212   :  { %v3373_v63 = vmul.f32 %v3038_v62, %v3034_v39  ;;  %v112_v62 = vrot.slane %v111_v59, 2 }
 0x214   :  { %v299_v2 = vsel %vm260_vm3, %v3373_v63, 0.0  ;;  %v2186_v8 = vcombine.high %v3373_v63, %v3229_v0  ;;  %v3388_v11 = vrot.slane %v3373_v63, %v2192_v5 }
 0x215   :  { %v3040_v6 = vpop.eup %3039  ;;  %300 = vadd.xlane.f32.xlu0 %v299_v2  ;;  %v113_v2 = vadd.f32 %v112_v62, %v111_v59 }
 0x216   :  { %v3378_v7 = vmul.f32 %v3040_v6, %v3036_v42  ;;  %v2200_v15 = vrot.slane %v2186_v8, %v2192_v5  ;;  %v2930_v42 = vld [vmem:[%s3997_s5 + $0x30] sm:$0xff]  }
 0x217   :  { %2732 = vmatpush3.bf16.msra.mxu1 %v2930_v42  ;;  %v114_v6 = vrot.slane %v113_v2, 1 }
 0x218   :  { %v302_v10 = vsel %vm260_vm3, %v3378_v7, 0.0  ;;  %v3391_v12 = vrot.slane %v3378_v7, %v2192_v5  ;;  %v2201_v13 = vcombine.high %v3378_v7, %v3229_v0  ;;  %2733 = vmatprep.subr.bf16.mxu1 %v3229_v0 }
 0x219   :  { %303 = vadd.xlane.f32.xlu0 %v302_v10  ;;  %v115_v10 = vadd.f32 %v114_v6, %v113_v2 }
 0x21a   :  { %v2216_v14 = vcombine.low %v3388_v11, %v3391_v12  ;;  %v2215_v16 = vrot.slane %v2201_v13, %v2192_v5  ;;  %v106_v5 = vadd.f32 %v105_v1, %v104_v61 }
 0x21b   :  { %2734 = vmatpush3.bf16.msra.mxu1 %v2931_v46  ;;  %v3491_v46 = vsub.s32 0, %v3371_v60 }
 0x21c   :  { %v3398_v17 = vrot.slane %v2216_v14, %v3383_v9  ;;  %v2232_v18 = vcombine.low %v2200_v15, %v2215_v16  ;;  %v2233_v19 = vcombine.high %v2200_v15, %v2215_v16  ;;  %2735 = vmatprep.subr.bf16.mxu1 %v3229_v0  ;;  %v107_v8 = vrot.slane %v106_v5, 1 }
 0x21d   :  { %v118_v14 = vmul.f32 0.125, %v115_v10 }
 0x21e   :  { %v3401_v20 = vrot.slane %v2232_v18, %v3383_v9  ;;  %v3404_v21 = vrot.slane %v2233_v19, %v3383_v9  ;;  %v108_v13 = vadd.f32 %v107_v8, %v106_v5 }
 0x21f   :  { %2736 = vmatpush3.bf16.msra.mxu1 %v2932_v50 }
 0x220   :  { %2737 = vmatprep.subr.bf16.mxu1 %v3229_v0  ;;  %v117_v15 = vmul.f32 0.125, %v108_v13 }
 0x222   :  { %v3461_v16 = vsel %vm325_vm4, %v118_v14, %v117_v15 }
 0x223   :  { %2738 = vmatpush3.bf16.msra.mxu1 %v2933_v51 }
 0x224   :  { %2739 = vmatprep.subr.bf16.mxu1 %v3229_v0 }
 0x227   :  { %2740 = vmatpush3.bf16.msra.mxu1 %v2934_v52 }
 0x228   :  { %2741 = vmatprep.subr.bf16.mxu1 %v3229_v0 }
 0x22b   :  { %2742 = vmatpush3.bf16.msra.mxu1 %v2935_v53 }
 0x22c   :  { %2743 = vmatprep.subr.bf16.mxu1 %v3229_v0 }
 0x22f   :  { %2744 = vmatpush3.bf16.msra.mxu1 %v2936_v23 }
 0x230   :  { %2781 = vmatprep.subr.bf16.mxu1 %v3229_v0 }
 0x29e   :  { %v301_v25 = vpop.xlane.xlu0 %300 }
 0x29f   :  { %v305_v26 = vmul.f32 0.125, %v301_v25 }
 0x2a1   :  { %v307_v27 = vmul.f32 %v305_v26, %v3336_v3 }
 0x2a2   :  { %v304_v28 = vpop.xlane.xlu0 %303 }
 0x2a3   :  { %v309_v29 = vsel %vm101_vm1, %v307_v27, 0.0  ;;  %v306_v30 = vmul.f32 0.125, %v304_v28 }
 0x2a4   :  { %v310_v31 = vrot.slane %v309_v29, 4 }
 0x2a5   :  { %v308_v32 = vmul.f32 %v306_v30, %v3338_v4 }
 0x2a6   :  { %v311_v33 = vadd.f32 %v310_v31, %v309_v29  ;;  %v2414_v31 = vld [vmem:[#allocation7] ss:$0 sm:$0xff] }
 0x2a7   :  { %v316_v35 = vsel %vm101_vm1, %v308_v32, 0.0 }
 0x2a8   :  { %v312_v36 = vrot.slane %v311_v33, 2  ;;  %v317_v37 = vrot.slane %v316_v35, 4 }
 0x2aa   :  { %v318_v38 = vadd.f32 %v317_v37, %v316_v35  ;;  %v313_v39 = vadd.f32 %v312_v36, %v311_v33 }
 0x2ac   :  { %v319_v41 = vrot.slane %v318_v38, 2  ;;  %v314_v43 = vrot.slane %v313_v39, 1 }
 0x2ae   :  { %v320_v44 = vadd.f32 %v319_v41, %v318_v38  ;;  %v315_v47 = vadd.f32 %v314_v43, %v313_v39  ;;  %v538_v41 = vunpack.c.l.s4 %v3234_v40 }
 0x2b0   :  { %v321_v45 = vrot.slane %v320_v44, 1  ;;  %v539_v42 = vunpack.c.0.s8 %v538_v41 }
 0x2b2   :  { %v322_v48 = vadd.f32 %v321_v45, %v320_v44  ;;  %v3484_v43 = vsub.s32 %v539_v42, %v3371_v60 }
 0x2b4   :  { %v330_v49 = vsel %vm325_vm4, %v322_v48, %v315_v47 }
 0x2b5   :  { %331 = vrot.lane.b32.xlu1 %v330_v49, %s3233_s17 }
 0x327   :  { %v332_v18 = vpop.permute.xlu1 %331 }
 0x328   :  { %v334_v19 = vsel %vm101_vm1, %v3461_v16, %v332_v18 }
 0x329   :  { %v343_v22 = vpack.c.bf16 %v334_v19, %v334_v19 }
 0x32b   :  { %2726 = vmatmul.mubr.msk.bf16.vlgmr.msra.gmra.mxu0 %vm215_vm2, %v343_v22 }
 0x32c   :  { %2753 = vmatprep.mubr.msk.bf16.mxu0 %vm3230_vm0, %v3229_v0 }
 0x3eb   :  { %v412_v25 = vpop.f32.mrf.mxu0 }
 0x3ec   :  { %v413_v26 = vadd.f32 %v2408_v24, %v412_v25 }
 0x3ed   :  { %v2727_v27 = vpop.f32.mrf.mxu0 }
 0x3ee   :  { %v3475_v28 = vpack.c.bf16 %v413_v26, %v413_v26 }
 0x3ef   :  { %v415_v29 = vpop.f32.mrf.mxu0 }
 0x3f0   :  { %2746 = vmatmul.mubr.bf16.vlgmr.msra.gmra.mxu1 %v3475_v28 }
 0x3f1   :  { %v2728_v30 = vpop.f32.mrf.mxu0  ;;  %2797 = vmatprep.mubr.msk.bf16.mxu1 %vm3230_vm0, %v3229_v0 }
 0x4b0   :  { %v524_v32 = vpop.f32.mrf.mxu1 }
 0x4b1   :  { %v3480_v33 = vadd.f32 %v2414_v31, %v524_v32 }
 0x4b2   :  { %v2747_v34 = vpop.f32.mrf.mxu1 }
 0x4b3   :  { %v2423_v35 = vmul.f32 -1.442695, %v3480_v33 }
 0x4b4   :  { %v527_v36 = vpop.f32.mrf.mxu1 }
 0x4b5   :  { %3041 = vpow2.f32 %v2423_v35 }
 0x4b6   :  { %v2748_v37 = vpop.f32.mrf.mxu1 }
 0x4c2   :  { %v3042_v38 = vpop.eup %3041 }
 0x4c3   :  { %v533_v39 = vadd.f32 1.0, %v3042_v38 }
 0x4c5   :  { %3043 = vrcp.f32 %v533_v39 }
 0x4d2   :  { %v3486_v44 = vpop.eup %3043 }
 0x4d3   :  { %v543_v45 = vrot.slane %v3486_v44, %v3484_v43 }
 0x4d5   :  { %v551_v47 = vrot.slane %v543_v45, %v3484_v43  ;;  %v544_v48 = vcombine.high %v543_v45, %v543_v45 }
 0x4d7   :  { %v562_v49 = vrot.slane %v551_v47, %v3491_v46  ;;  %v558_v50 = vrot.slane %v544_v48, %v3484_v43  ;;  %v2937_v47 = vld [vmem:[#allocation5 + $0x18] sm:$0xff]   ;;  %v2938_v48 = vld [vmem:[#allocation5 + $0x10] sm:$0xff]  }
 0x4d8   :  { %2750 = vmatpush3.bf16.msra.mxu0 %v2937_v47 }
 0x4d9   :  { %v569_v51 = vmul.f32 %v562_v49, %v3373_v63  ;;  %v566_v52 = vrot.slane %v558_v50, %v3491_v46  ;;  %2751 = vmatprep.subr.bf16.mxu0 %v3229_v0  ;;  %v3508_v49 = vand.u32 127, %v540_v55 }
 0x4db   :  { %v571_v53 = vsel %vm260_vm3, %v569_v51, -inf  ;;  %v570_v54 = vmul.f32 %v566_v52, %v3378_v7  ;;  %v2299_v50 = vadd.s32 4294967232, %v3508_v49 }
 0x4dc   :  { %v572_v56 = vrot.slane %v571_v53, 4  ;;  %2752 = vmatpush3.bf16.msra.mxu0 %v2938_v48 }
 0x4dd   :  { %v578_v57 = vsel %vm260_vm3, %v570_v54, -inf  ;;  %2757 = vmatprep.subr.bf16.mxu0 %v3229_v0  ;;  %v2302_v52 = vsub.s32 %v2299_v50, %v3371_v60 }
 0x4de   :  { %v573_v58 = vmax.f32 %v571_v53, %v572_v56  ;;  %v579_v59 = vrot.slane %v578_v57, 4 }
 0x4e0   :  { %v574_v61 = vrot.slane %v573_v58, 2  ;;  %v580_v62 = vmax.f32 %v578_v57, %v579_v59 }
 0x4e2   :  { %v575_v1 = vmax.f32 %v573_v58, %v574_v61  ;;  %v581_v2 = vrot.slane %v580_v62, 2 }
 0x4e4   :  { %v576_v5 = vrot.slane %v575_v1, 1  ;;  %v582_v6 = vmax.f32 %v580_v62, %v581_v2  ;;  %v2942_v2 = vld [vmem:[%s3996_s4 + $0x20] sm:$0xff]  }
 0x4e6   :  { %v577_v8 = vmax.f32 %v575_v1, %v576_v5  ;;  %v583_v10 = vrot.slane %v582_v6, 1  ;;  %v2941_v1 = vld [vmem:[%s3996_s4 + $0x28] sm:$0xff]  }
 0x4e8   :  { %v585_v63 = vsub.f32 %v569_v51, %v577_v8  ;;  %v584_v13 = vmax.f32 %v582_v6, %v583_v10 }
 0x4ea   :  { %v587_v14 = vmul.f32 1.442695, %v585_v63  ;;  %v586_v15 = vsub.f32 %v570_v54, %v584_v13 }
 0x4ec   :  { %3045 = vpow2.f32 %v587_v14  ;;  %v589_v18 = vmul.f32 1.442695, %v586_v15 }
 0x4ee   :  { %3047 = vpow2.f32 %v589_v18 }
 0x4f9   :  { %v3046_v7 = vpop.eup %3045 }
 0x4fa   :  { %v591_v19 = vsel %vm260_vm3, %v3046_v7, 0.0 }
 0x4fb   :  { %v3048_v22 = vpop.eup %3047  ;;  %v592_v23 = vrot.slane %v591_v19, 4 }
 0x4fc   :  { %v598_v24 = vsel %vm260_vm3, %v3048_v22, 0.0 }
 0x4fd   :  { %v593_v25 = vadd.f32 %v592_v23, %v591_v19  ;;  %v599_v26 = vrot.slane %v598_v24, 4 }
 0x4ff   :  { %v594_v27 = vrot.slane %v593_v25, 2  ;;  %v600_v29 = vadd.f32 %v599_v26, %v598_v24 }
 0x501   :  { %v595_v30 = vadd.f32 %v594_v27, %v593_v25  ;;  %v601_v31 = vrot.slane %v600_v29, 2 }
 0x503   :  { %v596_v32 = vrot.slane %v595_v30, 1  ;;  %v602_v34 = vadd.f32 %v601_v31, %v600_v29 }
 0x505   :  { %v597_v35 = vadd.f32 %v596_v32, %v595_v30  ;;  %v603_v36 = vrot.slane %v602_v34, 1 }
 0x507   :  { %3049 = vrcp.f32 %v597_v35  ;;  %v604_v37 = vadd.f32 %v603_v36, %v602_v34 }
 0x509   :  { %3051 = vrcp.f32 %v604_v37 }
 0x514   :  { %v3050_v38 = vpop.eup %3049 }
 0x515   :  { %v607_v39 = vmul.f32 %v3050_v38, %v3046_v7 }
 0x516   :  { %v3052_v40 = vpop.eup %3051 }
 0x517   :  { %v609_v41 = vsel %vm260_vm3, %v607_v39, 0.0  ;;  %v608_v42 = vmul.f32 %v3052_v40, %v3048_v22 }
 0x518   :  { %610 = vadd.xlane.f32.xlu1 %v609_v41 }
 0x519   :  { %v612_v45 = vsel %vm260_vm3, %v608_v42, 0.0 }
 0x51a   :  { %613 = vadd.xlane.f32.xlu0 %v612_v45 }
 0x5a1   :  { %v611_v51 = vpop.xlane.xlu1 %610 }
 0x5a2   :  { %v615_v53 = vmul.f32 0.125, %v611_v51 }
 0x5a3   :  { %v614_v54 = vpop.xlane.xlu0 %613 }
 0x5a4   :  { %v616_v56 = vmul.f32 0.125, %v614_v54  ;;  %v3513_v57 = vmul.f32 %v615_v53, %v3336_v3  ;;  %v2303_v58 = vrot.slane %v615_v53, %v2302_v52  ;;  %v2939_v3 = vld [vmem:[%s3996_s4 + $0x38] sm:$0xff]  }
 0x5a6   :  { %v3516_v59 = vmul.f32 %v616_v56, %v3338_v4  ;;  %v2307_v61 = vrot.slane %v616_v56, %v2302_v52  ;;  %v2940_v4 = vld [vmem:[%s3996_s4 + $0x30] sm:$0xff]  }
 0x5a8   :  { %v624_v55 = vpack.c.bf16 %v3516_v59, %v3513_v57  ;;  %v3521_v62 = vsel %vm325_vm4, %v2307_v61, %v2303_v58 }
 0x5aa   :  { %2754 = vmatmul.mubr.msk.bf16.vlgmr.msra.gmra.mxu0 %vm101_vm1, %v624_v55 }
 0x5ab   :  { %2765 = vmatprep.mubr.msk.bf16.mxu0 %vm3230_vm0, %v3229_v0  ;;  %2758 = vmatpush3.bf16.msra.mxu0 %v2939_v3 }
 0x5ac   :  { %2759 = vmatprep.subr.bf16.mxu0 %v3229_v0 }
 0x5af   :  { %2760 = vmatpush3.bf16.msra.mxu0 %v2940_v4 }
 0x5b0   :  { %2761 = vmatprep.subr.bf16.mxu0 %v3229_v0 }
 0x5b3   :  { %2762 = vmatpush3.bf16.msra.mxu0 %v2941_v1 }
 0x5b4   :  { %2763 = vmatprep.subr.bf16.mxu0 %v3229_v0 }
 0x5b7   :  { %2764 = vmatpush3.bf16.msra.mxu0 %v2942_v2 }
 0x5b8   :  { %2769 = vmatprep.subr.bf16.mxu0 %v3229_v0 }
 0x66a   :  { %v674_v5 = vpop.f32.mrf.mxu0 }
 0x66b   :  { %3053 = vtanh.f32 %v674_v5 }
 0x66c   :  { %v2755_v6 = vpop.f32.mrf.mxu0 }
 0x66e   :  { %v677_v8 = vpop.f32.mrf.mxu0 }
 0x66f   :  { %3055 = vtanh.f32 %v677_v8 }
 0x670   :  { %v2756_v10 = vpop.f32.mrf.mxu0 }
 0x678   :  { %v3054_v63 = vpop.eup %3053 }
 0x67c   :  { %v3056_v13 = vpop.eup %3055 }
 0x67d   :  { %v692_v14 = vpack.c.bf16 %v3056_v13, %v3054_v63  ;;  %v2943_v13 = vld [vmem:[%s3994_s2 + $0x38] sm:$0xff]  }
 0x67f   :  { %2766 = vmatmul.mubr.msk.bf16.vlgmr.msra.gmra.mxu0 %vm215_vm2, %v692_v14  ;;  %v2944_v14 = vld [vmem:[%s3994_s2 + $0x30] sm:$0xff]  }
 0x680   :  { %2777 = vmatprep.mubr.msk.bf16.mxu0 %vm3230_vm0, %v3229_v0  ;;  %2770 = vmatpush3.bf16.msra.mxu0 %v2943_v13 }
 0x681   :  { %2771 = vmatprep.subr.bf16.mxu0 %v3229_v0 }
 0x684   :  { %2772 = vmatpush3.bf16.msra.mxu0 %v2944_v14 }
 0x685   :  { %2773 = vmatprep.subr.bf16.mxu0 %v3229_v0 }
 0x73f   :  { %v754_v15 = vpop.f32.mrf.mxu0 }
 0x740   :  { %v761_v18 = vsel %vm260_vm3, %v754_v15, -inf }
 0x741   :  { %v762_v7 = vrot.slane %v761_v18, 4  ;;  %v2767_v19 = vpop.f32.mrf.mxu0 }
 0x743   :  { %v763_v22 = vmax.f32 %v761_v18, %v762_v7  ;;  %v757_v23 = vpop.f32.mrf.mxu0 }
 0x744   :  { %v768_v24 = vsel %vm260_vm3, %v757_v23, -inf }
 0x745   :  { %v764_v25 = vrot.slane %v763_v22, 2  ;;  %v769_v26 = vrot.slane %v768_v24, 4  ;;  %v2768_v27 = vpop.f32.mrf.mxu0 }
 0x747   :  { %v765_v29 = vmax.f32 %v763_v22, %v764_v25  ;;  %v770_v30 = vmax.f32 %v768_v24, %v769_v26 }
 0x749   :  { %v766_v31 = vrot.slane %v765_v29, 1  ;;  %v771_v32 = vrot.slane %v770_v30, 2 }
 0x74b   :  { %v767_v34 = vmax.f32 %v765_v29, %v766_v31  ;;  %v772_v35 = vmax.f32 %v770_v30, %v771_v32  ;;  %v2946_v29 = vld [vmem:[%s3994_s2 + $0x20] sm:$0xff]  }
 0x74d   :  { %v775_v36 = vsub.f32 %v754_v15, %v767_v34  ;;  %v773_v37 = vrot.slane %v772_v35, 1  ;;  %v2945_v15 = vld [vmem:[%s3994_s2 + $0x28] sm:$0xff]  }
 0x74e   :  { %2774 = vmatpush3.bf16.msra.mxu0 %v2945_v15 }
 0x74f   :  { %v777_v38 = vmul.f32 1.442695, %v775_v36  ;;  %v774_v39 = vmax.f32 %v772_v35, %v773_v37  ;;  %2775 = vmatprep.subr.bf16.mxu0 %v3229_v0  ;;  %v2947_v35 = vld [vmem:[%s3997_s5 + $0x78] sm:$0xff]  }
 0x750   :  { %2782 = vmatpush3.bf16.msra.mxu1 %v2947_v35 }
 0x751   :  { %3057 = vpow2.f32 %v777_v38  ;;  %v776_v40 = vsub.f32 %v757_v23, %v774_v39  ;;  %2783 = vmatprep.subr.bf16.mxu1 %v3229_v0 }
 0x752   :  { %2776 = vmatpush3.bf16.msra.mxu0 %v2946_v29 }
 0x753   :  { %v779_v41 = vmul.f32 1.442695, %v776_v40  ;;  %2801 = vmatprep.subr.bf16.mxu0 %v3229_v0  ;;  %v2949_v40 = vld [vmem:[%s3997_s5 + $0x68] sm:$0xff]  }
 0x755   :  { %3059 = vpow2.f32 %v779_v41 }
 0x75e   :  { %v3058_v42 = vpop.eup %3057 }
 0x75f   :  { %v781_v45 = vsel %vm260_vm3, %v3058_v42, 0.0 }
 0x760   :  { %v782_v47 = vrot.slane %v781_v45, 4 }
 0x762   :  { %v3060_v48 = vpop.eup %3059  ;;  %v783_v50 = vadd.f32 %v782_v47, %v781_v45  ;;  %v2950_v47 = vld [vmem:[%s3997_s5 + $0x60] sm:$0xff]  }
 0x763   :  { %v788_v51 = vsel %vm260_vm3, %v3060_v48, 0.0 }
 0x764   :  { %v784_v52 = vrot.slane %v783_v50, 2  ;;  %v789_v53 = vrot.slane %v788_v51, 4 }
 0x766   :  { %v790_v54 = vadd.f32 %v789_v53, %v788_v51  ;;  %v785_v56 = vadd.f32 %v784_v52, %v783_v50  ;;  %v2952_v50 = vld [vmem:[%s3997_s5 + $0x50] sm:$0xff]   ;;  %v2953_v51 = vld [vmem:[%s3997_s5 + $0x48] sm:$0xff]  }
 0x768   :  { %v791_v58 = vrot.slane %v790_v54, 2  ;;  %v786_v61 = vrot.slane %v785_v56, 1 }
 0x76a   :  { %v787_v55 = vadd.f32 %v786_v61, %v785_v56  ;;  %v792_v3 = vadd.f32 %v791_v58, %v790_v54  ;;  %v2954_v56 = vld [vmem:[%s3997_s5 + $0x40] sm:$0xff]  }
 0x76b   :  { %v2449_v58 = vld [vmem:[%s3995_s3 + $0x1] ss:$0 sm:$0xff] }
 0x76c   :  { %3061 = vrcp.f32 %v787_v55  ;;  %v793_v4 = vrot.slane %v792_v3, 1 }
 0x76e   :  { %v794_v1 = vadd.f32 %v793_v4, %v792_v3 }
 0x770   :  { %3063 = vrcp.f32 %v794_v1 }
 0x779   :  { %v3062_v2 = vpop.eup %3061 }
 0x77a   :  { %v3549_v5 = vmul.f32 %v3062_v2, %v3058_v42 }
 0x77c   :  { %v799_v6 = vsel %vm260_vm3, %v3549_v5, 0.0 }
 0x77d   :  { %v3064_v8 = vpop.eup %3063  ;;  %800 = vadd.xlane.f32.xlu0 %v799_v6  ;;  %v2471_v6 = vld [vmem:[#allocation7 + $0x1] ss:$0 sm:$0xff] }
 0x77e   :  { %v3553_v10 = vmul.f32 %v3064_v8, %v3060_v48  ;;  %v2951_v48 = vld [vmem:[%s3997_s5 + $0x58] sm:$0xff]  }
 0x780   :  { %v802_v63 = vsel %vm260_vm3, %v3553_v10, 0.0 }
 0x781   :  { %803 = vadd.xlane.f32.xlu0 %v802_v63 }
 0x806   :  { %v801_v18 = vpop.xlane.xlu0 %800 }
 0x807   :  { %v805_v7 = vmul.f32 0.125, %v801_v18 }
 0x809   :  { %v807_v19 = vmul.f32 %v805_v7, %v3513_v57 }
 0x80a   :  { %v804_v22 = vpop.xlane.xlu0 %803 }
 0x80b   :  { %v809_v23 = vsel %vm101_vm1, %v807_v19, 0.0  ;;  %v806_v24 = vmul.f32 0.125, %v804_v22 }
 0x80c   :  { %v810_v25 = vrot.slane %v809_v23, 4 }
 0x80d   :  { %v808_v26 = vmul.f32 %v806_v24, %v3516_v59  ;;  %v2948_v59 = vld [vmem:[%s3997_s5 + $0x70] sm:$0xff]  }
 0x80e   :  { %v811_v27 = vadd.f32 %v810_v25, %v809_v23  ;;  %2784 = vmatpush3.bf16.msra.mxu1 %v2948_v59 }
 0x80f   :  { %v816_v30 = vsel %vm101_vm1, %v808_v26, 0.0  ;;  %2785 = vmatprep.subr.bf16.mxu1 %v3229_v0 }
 0x810   :  { %v812_v31 = vrot.slane %v811_v27, 2  ;;  %v817_v32 = vrot.slane %v816_v30, 4 }
 0x812   :  { %v813_v57 = vadd.f32 %v812_v31, %v811_v27  ;;  %v818_v34 = vadd.f32 %v817_v32, %v816_v30  ;;  %2786 = vmatpush3.bf16.msra.mxu1 %v2949_v40 }
 0x813   :  { %2787 = vmatprep.subr.bf16.mxu1 %v3229_v0 }
 0x814   :  { %v819_v36 = vrot.slane %v818_v34, 2  ;;  %v814_v38 = vrot.slane %v813_v57, 1 }
 0x816   :  { %v820_v37 = vadd.f32 %v819_v36, %v818_v34  ;;  %v815_v41 = vadd.f32 %v814_v38, %v813_v57  ;;  %2788 = vmatpush3.bf16.msra.mxu1 %v2950_v47 }
 0x817   :  { %2789 = vmatprep.subr.bf16.mxu1 %v3229_v0 }
 0x818   :  { %v821_v39 = vrot.slane %v820_v37, 1 }
 0x81a   :  { %v822_v42 = vadd.f32 %v821_v39, %v820_v37  ;;  %2790 = vmatpush3.bf16.msra.mxu1 %v2951_v48 }
 0x81b   :  { %2791 = vmatprep.subr.bf16.mxu1 %v3229_v0 }
 0x81c   :  { %v825_v45 = vsel %vm325_vm4, %v822_v42, %v815_v41 }
 0x81d   :  { %826 = vrot.lane.b32.xlu0 %v825_v45, %s3233_s17 }
 0x81e   :  { %2792 = vmatpush3.bf16.msra.mxu1 %v2952_v50 }
 0x81f   :  { %2793 = vmatprep.subr.bf16.mxu1 %v3229_v0 }
 0x822   :  { %2794 = vmatpush3.bf16.msra.mxu1 %v2953_v51 }
 0x823   :  { %2795 = vmatprep.subr.bf16.mxu1 %v3229_v0 }
 0x826   :  { %2796 = vmatpush3.bf16.msra.mxu1 %v2954_v56 }
 0x827   :  { %2821 = vmatprep.subr.bf16.mxu1 %v3229_v0 }
 0x88f   :  { %v827_v52 = vpop.permute.xlu0 %826 }
 0x890   :  { %v829_v53 = vsel %vm101_vm1, %v3461_v16, %v827_v52 }
 0x891   :  { %v839_v54 = vpack.c.bf16 %v829_v53, %v829_v53 }
 0x893   :  { %2778 = vmatmul.mubr.msk.bf16.vlgmr.msra.gmra.mxu0 %vm215_vm2, %v839_v54 }
 0x894   :  { %2805 = vmatprep.mubr.msk.bf16.mxu0 %vm3230_vm0, %v3229_v0 }
 0x953   :  { %v909_v61 = vpop.f32.mrf.mxu0 }
 0x954   :  { %v910_v55 = vadd.f32 %v2449_v58, %v909_v61 }
 0x955   :  { %v2779_v3 = vpop.f32.mrf.mxu0 }
 0x956   :  { %v3619_v4 = vpack.c.bf16 %v910_v55, %v910_v55 }
 0x957   :  { %v912_v1 = vpop.f32.mrf.mxu0 }
 0x958   :  { %2798 = vmatmul.mubr.bf16.vlgmr.msra.gmra.mxu1 %v3619_v4 }
 0x959   :  { %v2780_v2 = vpop.f32.mrf.mxu0  ;;  %2829 = vmatprep.mubr.msk.bf16.mxu1 %vm3230_vm0, %v3229_v0 }
 0xa18   :  { %v1023_v8 = vpop.f32.mrf.mxu1 }
 0xa19   :  { %v3624_v63 = vadd.f32 %v2471_v6, %v1023_v8 }
 0xa1a   :  { %v2799_v13 = vpop.f32.mrf.mxu1 }
 0xa1b   :  { %v2480_v14 = vmul.f32 -1.442695, %v3624_v63 }
 0xa1c   :  { %v1026_v15 = vpop.f32.mrf.mxu1 }
 0xa1d   :  { %3065 = vpow2.f32 %v2480_v14 }
 0xa1e   :  { %v2800_v18 = vpop.f32.mrf.mxu1 }
 0xa2a   :  { %v3066_v7 = vpop.eup %3065 }
 0xa2b   :  { %v1032_v19 = vadd.f32 1.0, %v3066_v7 }
 0xa2d   :  { %3067 = vrcp.f32 %v1032_v19 }
 0xa3a   :  { %v3627_v22 = vpop.eup %3067 }
 0xa3b   :  { %v1042_v23 = vrot.slane %v3627_v22, %v3484_v43 }
 0xa3d   :  { %v1050_v24 = vrot.slane %v1042_v23, %v3484_v43  ;;  %v1043_v25 = vcombine.high %v1042_v23, %v1042_v23 }
 0xa3f   :  { %v1061_v26 = vrot.slane %v1050_v24, %v3491_v46  ;;  %v1057_v27 = vrot.slane %v1043_v25, %v3484_v43 }
 0xa41   :  { %v1068_v29 = vmul.f32 %v1061_v26, %v3549_v5  ;;  %v1065_v30 = vrot.slane %v1057_v27, %v3491_v46  ;;  %v2955_v26 = vld [vmem:[#allocation5 + $0x28] sm:$0xff]   ;;  %v2956_v27 = vld [vmem:[#allocation5 + $0x20] sm:$0xff]  }
 0xa42   :  { %2802 = vmatpush3.bf16.msra.mxu0 %v2955_v26 }
 0xa43   :  { %v1070_v31 = vsel %vm260_vm3, %v1068_v29, -inf  ;;  %v1069_v32 = vmul.f32 %v1065_v30, %v3553_v10  ;;  %2803 = vmatprep.subr.bf16.mxu0 %v3229_v0 }
 0xa44   :  { %v1071_v57 = vrot.slane %v1070_v31, 4 }
 0xa45   :  { %v1077_v34 = vsel %vm260_vm3, %v1069_v32, -inf }
 0xa46   :  { %v1072_v35 = vmax.f32 %v1070_v31, %v1071_v57  ;;  %v1078_v36 = vrot.slane %v1077_v34, 4  ;;  %2804 = vmatpush3.bf16.msra.mxu0 %v2956_v27  ;;  %v2312_v31 = vadd.s32 4294967224, %v3508_v49 }
 0xa47   :  { %2809 = vmatprep.subr.bf16.mxu0 %v3229_v0 }
 0xa48   :  { %v1073_v59 = vrot.slane %v1072_v35, 2  ;;  %v1079_v37 = vmax.f32 %v1077_v34, %v1078_v36  ;;  %v2315_v57 = vsub.s32 %v2312_v31, %v3371_v60 }
 0xa4a   :  { %v1074_v38 = vmax.f32 %v1072_v35, %v1073_v59  ;;  %v1080_v39 = vrot.slane %v1079_v37, 2  ;;  %v3110_v59 = vld [vmem:[#allocation2 + $0x8] sm:$0xff] }
 0xa4c   :  { %v1075_v40 = vrot.slane %v1074_v38, 1  ;;  %v1081_v41 = vmax.f32 %v1079_v37, %v1080_v39 }
 0xa4e   :  { %v1076_v42 = vmax.f32 %v1074_v38, %v1075_v40  ;;  %v1082_v45 = vrot.slane %v1081_v41, 1  ;;  %v2957_v40 = vld [vmem:[%s3996_s4 + $0x58] sm:$0xff]  }
 0xa50   :  { %v1084_v5 = vsub.f32 %v1068_v29, %v1076_v42  ;;  %v1083_v47 = vmax.f32 %v1081_v41, %v1082_v45  ;;  %v2217_v29 = vcombine.high %v3388_v11, %v3391_v12  ;;  %v3109_v12 = vld [vmem:[#allocation2] sm:$0xff]  ;;  %v2958_v41 = vld [vmem:[%s3996_s4 + $0x50] sm:$0xff]   ;;  %v2959_v42 = vld [vmem:[%s3996_s4 + $0x48] sm:$0xff]  }
 0xa51   :  { %v2960_v45 = vld [vmem:[%s3996_s4 + $0x40] sm:$0xff]  }
 0xa52   :  { %v1086_v48 = vmul.f32 1.442695, %v1084_v5  ;;  %v1085_v50 = vsub.f32 %v1069_v32, %v1083_v47  ;;  %v3648_v30 = vrot.slane %v2217_v29, %v3383_v9 }
 0xa54   :  { %3069 = vpow2.f32 %v1086_v48  ;;  %v1088_v51 = vmul.f32 1.442695, %v1085_v50 }
 0xa56   :  { %3071 = vpow2.f32 %v1088_v51 }
 0xa61   :  { %v3070_v10 = vpop.eup %3069 }
 0xa62   :  { %v1090_v52 = vsel %vm260_vm3, %v3070_v10, 0.0 }
 0xa63   :  { %v3072_v53 = vpop.eup %3071  ;;  %v1091_v54 = vrot.slane %v1090_v52, 4 }
 0xa64   :  { %v1097_v56 = vsel %vm260_vm3, %v3072_v53, 0.0 }
 0xa65   :  { %v1092_v58 = vadd.f32 %v1091_v54, %v1090_v52  ;;  %v1098_v61 = vrot.slane %v1097_v56, 4 }
 0xa67   :  { %v1093_v55 = vrot.slane %v1092_v58, 2  ;;  %v1099_v3 = vadd.f32 %v1098_v61, %v1097_v56 }
 0xa69   :  { %v1094_v1 = vadd.f32 %v1093_v55, %v1092_v58  ;;  %v1100_v2 = vrot.slane %v1099_v3, 2 }
 0xa6b   :  { %v1095_v6 = vrot.slane %v1094_v1, 1  ;;  %v1101_v8 = vadd.f32 %v1100_v2, %v1099_v3 }
 0xa6d   :  { %v1096_v13 = vadd.f32 %v1095_v6, %v1094_v1  ;;  %v1102_v14 = vrot.slane %v1101_v8, 1 }
 0xa6f   :  { %3073 = vrcp.f32 %v1096_v13  ;;  %v1103_v15 = vadd.f32 %v1102_v14, %v1101_v8 }
 0xa71   :  { %3075 = vrcp.f32 %v1103_v15 }
 0xa7c   :  { %v3074_v18 = vpop.eup %3073 }
 0xa7d   :  { %v1106_v7 = vmul.f32 %v3074_v18, %v3070_v10 }
 0xa7e   :  { %v3076_v19 = vpop.eup %3075 }
 0xa7f   :  { %v1108_v23 = vsel %vm260_vm3, %v1106_v7, 0.0  ;;  %v1107_v24 = vmul.f32 %v3076_v19, %v3072_v53 }
 0xa80   :  { %1109 = vadd.xlane.f32.xlu1 %v1108_v23 }
 0xa81   :  { %v1111_v25 = vsel %vm260_vm3, %v1107_v24, 0.0 }
 0xa82   :  { %1112 = vadd.xlane.f32.xlu0 %v1111_v25 }
 0xa98   :  { %2257 = vrot.lane.b32.xlu0 %v3648_v30, %s3226_s25 }
 0xa9c   :  { %2175 = vrot.lane.b32.xlu0 %v3627_v22, %s3224_s19 }
 0xaa0   :  { %2337 = vrot.lane.b32.xlu0 %v3480_v33, %s3235_s0  ;;  %s3237_s0 = smov 40  }
 0xb09   :  { %v1110_v32 = vpop.xlane.xlu1 %1109 }
 0xb0a   :  { %v1114_v34 = vmul.f32 0.125, %v1110_v32 }
 0xb0b   :  { %v1113_v35 = vpop.xlane.xlu0 %1112 }
 0xb0c   :  { %v1115_v11 = vmul.f32 0.125, %v1113_v35  ;;  %v3657_v9 = vmul.f32 %v3109_v12, %v1114_v34  ;;  %v2316_v36 = vrot.slane %v1114_v34, %v2315_v57 }
 0xb0e   :  { %v3659_v37 = vmul.f32 %v3110_v59, %v1115_v11  ;;  %v2320_v38 = vrot.slane %v1115_v11, %v2315_v57 }
 0xb10   :  { %v1123_v39 = vpack.c.bf16 %v3659_v37, %v3657_v9  ;;  %v3664_v33 = vsel %vm325_vm4, %v2320_v38, %v2316_v36 }
 0xb12   :  { %2806 = vmatmul.mubr.msk.bf16.vlgmr.msra.gmra.mxu0 %vm101_vm1, %v1123_v39 }
 0xb13   :  { %2817 = vmatprep.mubr.msk.bf16.mxu0 %vm3230_vm0, %v3229_v0  ;;  %2810 = vmatpush3.bf16.msra.mxu0 %v2957_v40 }
 0xb14   :  { %2811 = vmatprep.subr.bf16.mxu0 %v3229_v0 }
 0xb17   :  { %2812 = vmatpush3.bf16.msra.mxu0 %v2958_v41 }
 0xb18   :  { %2813 = vmatprep.subr.bf16.mxu0 %v3229_v0 }
 0xb1b   :  { %2814 = vmatpush3.bf16.msra.mxu0 %v2959_v42 }
 0xb1c   :  { %2815 = vmatprep.subr.bf16.mxu0 %v3229_v0 }
 0xb1f   :  { %2816 = vmatpush3.bf16.msra.mxu0 %v2960_v45 }
 0xb20   :  { %2833 = vmatprep.subr.bf16.mxu0 %v3229_v0 }
 0xbd2   :  { %v1173_v5 = vpop.f32.mrf.mxu0 }
 0xbd3   :  { %3077 = vtanh.f32 %v1173_v5 }
 0xbd4   :  { %v2807_v47 = vpop.f32.mrf.mxu0 }
 0xbd6   :  { %v1176_v48 = vpop.f32.mrf.mxu0 }
 0xbd7   :  { %3079 = vtanh.f32 %v1176_v48 }
 0xbd8   :  { %v2808_v50 = vpop.f32.mrf.mxu0 }
 0xbe0   :  { %v3078_v51 = vpop.eup %3077 }
 0xbe4   :  { %v3080_v10 = vpop.eup %3079 }
 0xbe5   :  { %v1191_v52 = vpack.c.bf16 %v3080_v10, %v3078_v51 }
 0xbe7   :  { %2818 = vmatmul.mubr.msk.bf16.vlgmr.msra.gmra.mxu0 %vm215_vm2, %v1191_v52  ;;  %v2961_v52 = vld [vmem:[%s3994_s2 + $0x58] sm:$0xff]  }
 0xbe8   :  { %2849 = vmatprep.mubr.msk.bf16.mxu0 %vm3230_vm0, %v3229_v0  ;;  %2822 = vmatpush3.bf16.msra.mxu1 %v2961_v52  ;;  %v2976_v52 = vld [vmem:[%s3999_s7 + $0x10] sm:$0xff]  }
 0xbe9   :  { %2823 = vmatprep.subr.bf16.mxu1 %v3229_v0 }
 0xca7   :  { %v1253_v53 = vpop.f32.mrf.mxu0 }
 0xca8   :  { %v1261_v54 = vsel %vm1260_vm5, %v1253_v53, -inf }
 0xca9   :  { %v1262_v56 = vrot.slane %v1261_v54, 4  ;;  %v2819_v58 = vpop.f32.mrf.mxu0 }
 0xcab   :  { %v1263_v61 = vmax.f32 %v1261_v54, %v1262_v56  ;;  %v1256_v55 = vpop.f32.mrf.mxu0  ;;  %v2963_v54 = vld [vmem:[%s3994_s2 + $0x48] sm:$0xff]   ;;  %v2964_v56 = vld [vmem:[%s3994_s2 + $0x40] sm:$0xff]  }
 0xcac   :  { %v1268_v3 = vsel %vm1260_vm5, %v1256_v55, -inf }
 0xcad   :  { %v1264_v1 = vrot.slane %v1263_v61, 2  ;;  %v1269_v2 = vrot.slane %v1268_v3, 4  ;;  %v2820_v6 = vpop.f32.mrf.mxu0 }
 0xcaf   :  { %v1265_v8 = vmax.f32 %v1263_v61, %v1264_v1  ;;  %v1270_v13 = vmax.f32 %v1268_v3, %v1269_v2 }
 0xcb1   :  { %v1266_v14 = vrot.slane %v1265_v8, 1  ;;  %v1271_v15 = vrot.slane %v1270_v13, 2 }
 0xcb3   :  { %v1267_v18 = vmax.f32 %v1265_v8, %v1266_v14  ;;  %v1272_v7 = vmax.f32 %v1270_v13, %v1271_v15 }
 0xcb5   :  { %v1275_v19 = vsub.f32 %v1253_v53, %v1267_v18  ;;  %v1273_v23 = vrot.slane %v1272_v7, 1  ;;  %v2962_v53 = vld [vmem:[%s3994_s2 + $0x50] sm:$0xff]  }
 0xcb6   :  { %2824 = vmatpush3.bf16.msra.mxu1 %v2962_v53  ;;  %v2977_v53 = vld [vmem:[%s3999_s7 + $0x48] sm:$0xff]  }
 0xcb7   :  { %v1277_v24 = vmul.f32 1.442695, %v1275_v19  ;;  %v1274_v25 = vmax.f32 %v1272_v7, %v1273_v23  ;;  %2825 = vmatprep.subr.bf16.mxu1 %v3229_v0  ;;  %v2965_v7 = vld [vmem:[%s3999_s7 + $0x78] sm:$0xff]  }
 0xcb9   :  { %3081 = vpow2.f32 %v1277_v24  ;;  %v1276_v26 = vsub.f32 %v1256_v55, %v1274_v25 }
 0xcba   :  { %2826 = vmatpush3.bf16.msra.mxu1 %v2963_v54  ;;  %v2978_v54 = vld [vmem:[%s3999_s7 + $0x8] sm:$0xff]  }
 0xcbb   :  { %v1279_v27 = vmul.f32 1.442695, %v1276_v26  ;;  %2827 = vmatprep.subr.bf16.mxu1 %v3229_v0 }
 0xcbd   :  { %3083 = vpow2.f32 %v1279_v27 }
 0xcbe   :  { %2828 = vmatpush3.bf16.msra.mxu1 %v2964_v56  ;;  %v2979_v56 = vld [vmem:[%s3999_s7 + $0x40] sm:$0xff]  }
 0xcbf   :  { %2657 = vmatprep.subr.bf16.mxu1 %v2965_v7  ;;  %v2993_v7 = vld [vmem:[%s3999_s7 + $0x98] sm:$0xff]  }
 0xcc6   :  { %v3082_v29 = vpop.eup %3081 }
 0xcc7   :  { %v1281_v31 = vsel %vm1260_vm5, %v3082_v29, 0.0 }
 0xcc8   :  { %v1282_v32 = vrot.slane %v1281_v31, 4 }
 0xcca   :  { %v3084_v57 = vpop.eup %3083  ;;  %v1283_v34 = vadd.f32 %v1282_v32, %v1281_v31  ;;  %v2248_v31 = vcombine.high %v3398_v17, %v3229_v0  ;;  %v2249_v32 = vcombine.high %v3648_v30, %v3229_v0  ;;  %v2981_v30 = vld [vmem:[%s3997_s5 + $0xb8] sm:$0xff]  }
 0xccb   :  { %v1288_v35 = vsel %vm1260_vm5, %v3084_v57, 0.0  ;;  %2834 = vmatpush3.bf16.msra.mxu0 %v2981_v30  ;;  %v3003_v30 = vld [vmem:[%s4001_s9 + $0x50] ss:$8 sps:$4 sm:$0xff]  }
 0xccc   :  { %v1284_v11 = vrot.slane %v1283_v34, 2  ;;  %v1289_v12 = vrot.slane %v1288_v35, 4  ;;  %2835 = vmatprep.subr.bf16.mxu0 %v3229_v0 }
 0xcce   :  { %v1290_v36 = vadd.f32 %v1289_v12, %v1288_v35  ;;  %v1285_v59 = vadd.f32 %v1284_v11, %v1283_v34  ;;  %v2251_v34 = vcombine.high %v3404_v21, %v3229_v0  ;;  %v2982_v35 = vld [vmem:[%s3997_s5 + $0xb0] sm:$0xff]   ;;  %v2985_v11 = vld [vmem:[%s3997_s5 + $0x98] sm:$0xff]  }
 0xccf   :  { %2836 = vmatpush3.bf16.msra.mxu0 %v2982_v35  ;;  %v2986_v12 = vld [vmem:[%s3997_s5 + $0x90] sm:$0xff]   ;;  %v3008_v35 = vld [vmem:[%s4001_s9 + $0x44] ss:$8 sps:$4 sm:$0xff]  }
 0xcd0   :  { %v1291_v38 = vrot.slane %v1290_v36, 2  ;;  %v1286_v39 = vrot.slane %v1285_v59, 1  ;;  %2837 = vmatprep.subr.bf16.mxu0 %v3229_v0 }
 0xcd2   :  { %v1287_v40 = vadd.f32 %v1286_v39, %v1285_v59  ;;  %v1292_v41 = vadd.f32 %v1291_v38, %v1290_v36  ;;  %v2987_v36 = vld [vmem:[%s3997_s5 + $0x88] sm:$0xff]   ;;  %v2966_v39 = vld [vmem:[%s3999_s7 + $0x38] sm:$0xff]  }
 0xcd4   :  { %3085 = vrcp.f32 %v1287_v40  ;;  %v1293_v42 = vrot.slane %v1292_v41, 1 }
 0xcd6   :  { %v1294_v45 = vadd.f32 %v1293_v42, %v1292_v41  ;;  %v2967_v41 = vld [vmem:[%s3999_s7 + $0x70] sm:$0xff]  }
 0xcd7   :  { %v2968_v42 = vld [vmem:[%s3999_s7 + $0x30] sm:$0xff]  }
 0xcd8   :  { %3087 = vrcp.f32 %v1294_v45  ;;  %v2970_v45 = vld [vmem:[%s3999_s7 + $0x28] sm:$0xff]  }
 0xce1   :  { %v3086_v5 = vpop.eup %3085 }
 0xce2   :  { %v3692_v47 = vmul.f32 %v3086_v5, %v3082_v29  ;;  %v2971_v5 = vld [vmem:[%s3999_s7 + $0x60] sm:$0xff]  }
 0xce4   :  { %v1299_v48 = vsel %vm1260_vm5, %v3692_v47, 0.0 }
 0xce5   :  { %v3088_v50 = vpop.eup %3087  ;;  %1300 = vadd.xlane.f32.xlu1 %v1299_v48  ;;  %v2973_v48 = vld [vmem:[%s3999_s7 + $0x58] sm:$0xff]  }
 0xce6   :  { %v3696_v51 = vmul.f32 %v3088_v50, %v3084_v57  ;;  %v2250_v57 = vcombine.high %v3401_v20, %v3229_v0  ;;  %v2974_v50 = vld [vmem:[%s3999_s7 + $0x18] sm:$0xff]  }
 0xce8   :  { %v1302_v10 = vsel %vm1260_vm5, %v3696_v51, 0.0 }
 0xce9   :  { %1303 = vadd.xlane.f32.xlu1 %v1302_v10  ;;  %v2975_v10 = vld [vmem:[%s3999_s7 + $0x50] sm:$0xff]  }
 0xd6e   :  { %v1301_v58 = vpop.xlane.xlu1 %1300 }
 0xd6f   :  { %v1306_v61 = vmul.f32 0.0625, %v1301_v58  ;;  %v2980_v58 = vld [vmem:[%s3999_s7] sm:$0xff]  }
 0xd71   :  { %v1308_v55 = vmul.f32 %v1306_v61, %v3657_v9  ;;  %v2988_v61 = vld [vmem:[%s3997_s5 + $0x80] sm:$0xff]  }
 0xd72   :  { %v1304_v3 = vpop.xlane.xlu1 %1303 }
 0xd73   :  { %v1310_v1 = vsel %vm101_vm1, %v1308_v55, 0.0  ;;  %v1307_v2 = vmul.f32 0.0625, %v1304_v3  ;;  %v2506_v55 = vld [vmem:[%s3995_s3 + $0x2] ss:$0 sm:$0xff] }
 0xd74   :  { %v1311_v6 = vrot.slane %v1310_v1, 4 }
 0xd75   :  { %v1309_v8 = vmul.f32 %v1307_v2, %v3659_v37 }
 0xd76   :  { %v1312_v13 = vadd.f32 %v1311_v6, %v1310_v1  ;;  %v2989_v6 = vld [vmem:[%s3999_s7 + $0xb8] sm:$0xff]  }
 0xd77   :  { %v1317_v14 = vsel %vm101_vm1, %v1309_v8, 0.0 }
 0xd78   :  { %v1313_v15 = vrot.slane %v1312_v13, 2  ;;  %v1318_v18 = vrot.slane %v1317_v14, 4 }
 0xd7a   :  { %v1314_v19 = vadd.f32 %v1313_v15, %v1312_v13  ;;  %v1319_v23 = vadd.f32 %v1318_v18, %v1317_v14  ;;  %v2990_v14 = vld [vmem:[%s3999_s7 + $0xb0] sm:$0xff]   ;;  %v2991_v15 = vld [vmem:[%s3999_s7 + $0xa8] sm:$0xff]   ;;  %v2992_v18 = vld [vmem:[%s3999_s7 + $0xa0] sm:$0xff]  }
 0xd7c   :  { %v1320_v9 = vrot.slane %v1319_v23, 2  ;;  %v1315_v25 = vrot.slane %v1314_v19, 1 }
 0xd7e   :  { %v1321_v24 = vadd.f32 %v1320_v9, %v1319_v23  ;;  %v1316_v27 = vadd.f32 %v1315_v25, %v1314_v19  ;;  %v2994_v19 = vld [vmem:[%s3999_s7 + $0x90] sm:$0xff]   ;;  %v2995_v23 = vld [vmem:[%s3999_s7 + $0x88] sm:$0xff]   ;;  %v2996_v9 = vld [vmem:[%s3999_s7 + $0x80] sm:$0xff]  }
 0xd80   :  { %v1322_v26 = vrot.slane %v1321_v24, 1 }
 0xd82   :  { %v1323_v29 = vadd.f32 %v1322_v26, %v1321_v24 }
 0xd84   :  { %v1326_v37 = vsel %vm325_vm4, %v1323_v29, %v1316_v27 }
 0xd85   :  { %1327 = vrot.lane.b32.xlu1 %v1326_v37, %s3233_s17  ;;  %v2999_v37 = vld [vmem:[%s4001_s9 + $0x74] ss:$8 sps:$4 sm:$0xff]  }
 0xd89   :  { %2253 = vrot.lane.b32.xlu1 %v2248_v31, %s3224_s19  ;;  %v2997_v31 = vld [vmem:[%s4001_s9 + $0x70] ss:$8 sps:$4 sm:$0xff]  }
 0xd8d   :  { %2261 = vrot.lane.b32.xlu1 %v2249_v32, %s3236_s28  ;;  %v3002_v32 = vld [vmem:[%s4001_s9 + $0x64] ss:$8 sps:$4 sm:$0xff]  }
 0xd91   :  { %2265 = vrot.lane.b32.xlu1 %v3401_v20, %s3233_s17  ;;  %v2983_v20 = vld [vmem:[%s3997_s5 + $0xa8] sm:$0xff]  }
 0xd92   :  { %2838 = vmatpush3.bf16.msra.mxu0 %v2983_v20  ;;  %v3006_v20 = vld [vmem:[%s4001_s9 + $0x40] ss:$8 sps:$4 sm:$0xff]  }
 0xd93   :  { %2839 = vmatprep.subr.bf16.mxu0 %v3229_v0 }
 0xd95   :  { %2269 = vrot.lane.b32.xlu1 %v2250_v57, %s3237_s0  ;;  %v3000_v57 = vld [vmem:[%s4001_s9 + $0x60] ss:$8 sps:$4 sm:$0xff]   ;;  %s3241_s0 = smov 104  }
 0xd99   :  { %2273 = vrot.lane.b32.xlu1 %v3404_v21, %s3238_s29  ;;  %v2984_v21 = vld [vmem:[%s3997_s5 + $0xa0] sm:$0xff]  }
 0xd9a   :  { %2840 = vmatpush3.bf16.msra.mxu0 %v2984_v21  ;;  %v3011_v21 = vld [vmem:[%s4001_s9 + $0x34] ss:$8 sps:$4 sm:$0xff]  }
 0xd9b   :  { %2841 = vmatprep.subr.bf16.mxu0 %v3229_v0 }
 0xd9d   :  { %2277 = vrot.lane.b32.xlu1 %v2251_v34, %s3239_s15  ;;  %v3005_v34 = vld [vmem:[%s4001_s9 + $0x54] ss:$8 sps:$4 sm:$0xff]  }
 0xd9e   :  { %2842 = vmatpush3.bf16.msra.mxu0 %v2985_v11  ;;  %v3009_v11 = vld [vmem:[%s4001_s9 + $0x30] ss:$8 sps:$4 sm:$0xff]  }
 0xd9f   :  { %2843 = vmatprep.subr.bf16.mxu0 %v3229_v0 }
 0xda2   :  { %2844 = vmatpush3.bf16.msra.mxu0 %v2986_v12  ;;  %v3014_v12 = vld [vmem:[%s4001_s9 + $0x24] ss:$8 sps:$4 sm:$0xff]  }
 0xda3   :  { %2845 = vmatprep.subr.bf16.mxu0 %v3229_v0 }
 0xda6   :  { %2846 = vmatpush3.bf16.msra.mxu0 %v2987_v36  ;;  %v3012_v36 = vld [vmem:[%s4001_s9 + $0x20] ss:$8 sps:$4 sm:$0xff]  }
 0xda7   :  { %2847 = vmatprep.subr.bf16.mxu0 %v3229_v0 }
 0xdaa   :  { %2848 = vmatpush3.bf16.msra.mxu0 %v2988_v61 }
 0xdab   :  { %2853 = vmatprep.subr.bf16.mxu0 %v3229_v0 }
 0xdf7   :  { %v1328_v59 = vpop.permute.xlu1 %1327 }
 0xdf8   :  { %v1330_v38 = vsel %vm101_vm1, %v3461_v16, %v1328_v59  ;;  %v2969_v16 = vld [vmem:[%s3999_s7 + $0x68] sm:$0xff]   ;;  %v3017_v59 = vld [vmem:[%s4001_s9 + $0x14] ss:$8 sps:$4 sm:$0xff]  }
 0xdf9   :  { %v1340_v40 = vpack.c.bf16 %v1330_v38, %v1330_v38  ;;  %v3015_v38 = vld [vmem:[%s4001_s9 + $0x10] ss:$8 sps:$4 sm:$0xff]  }
 0xdfb   :  { %2830 = vmatmul.mubr.msk.bf16.vlgmr.msra.gmra.mxu1 %vm215_vm2, %v1340_v40  ;;  %v3018_v40 = vld [vmem:[%s4001_s9] ss:$8 sps:$4 sm:$0xff]  }
 0xdfc   :  { %2658 = vmatpush3.bf16.msra.mxu1 %v2966_v39  ;;  %1848 = vmatprep.mubr.bf16.mxu1 %v3619_v4  ;;  %v2972_v4 = vld [vmem:[%s3999_s7 + $0x20] sm:$0xff]  }
 0xdfd   :  { %2659 = vmatprep.subr.bf16.mxu1 %v2967_v41  ;;  %v3020_v39 = vld [vmem:[%s4001_s9 + $0x4] ss:$8 sps:$4 sm:$0xff]   ;;  %v3240_v41 = vmov 0  }
 0xe00   :  { %2660 = vmatpush3.bf16.msra.mxu1 %v2968_v42  ;;  %v2528_v42 = vld [vmem:[#allocation7 + $0x2] ss:$0 sm:$0xff] }
 0xe01   :  { %2661 = vmatprep.subr.bf16.mxu1 %v2969_v16 }
 0xe04   :  { %2662 = vmatpush3.bf16.msra.mxu1 %v2970_v45 }
 0xe05   :  { %2663 = vmatprep.subr.bf16.mxu1 %v2971_v5 }
 0xe08   :  { %2664 = vmatpush3.bf16.msra.mxu1 %v2972_v4 }
 0xe09   :  { %2665 = vmatprep.subr.bf16.mxu1 %v2973_v48 }
 0xe0c   :  { %2666 = vmatpush3.bf16.msra.mxu1 %v2974_v50 }
 0xe0d   :  { %2667 = vmatprep.subr.bf16.mxu1 %v2975_v10 }
 0xe10   :  { %2668 = vmatpush3.bf16.msra.mxu1 %v2976_v52 }
 0xe11   :  { %2669 = vmatprep.subr.bf16.mxu1 %v2977_v53  ;;  %v2538_v53 = vld [vmem:[%s4000_s8] ss:$0 sm:$0xff] }
 0xe14   :  { %2670 = vmatpush3.bf16.msra.mxu1 %v2978_v54 }
 0xe15   :  { %2671 = vmatprep.subr.bf16.mxu1 %v2979_v56 }
 0xe18   :  { %2672 = vmatpush3.bf16.msra.mxu1 %v2980_v58 }
 0xe19   :  { %2005 = vmatprep.subr.bf16.mxu1 %v2999_v37 }
 0xe1b   :  { %1849 = vmatmul.mubr.bf16.vlgmr.msra.gmra.mxu1 %v3475_v28 }
 0xe1c   :  { %2006 = vmatpush1.bf16.msra.mxu1 %v2997_v31  ;;  %2037 = vmatprep.mubr.bf16.mxu1 %v3240_v41 }
 0xe1d   :  { %2007 = vmatprep.subr.bf16.mxu1 %v3002_v32 }
 0xe20   :  { %2008 = vmatpush1.bf16.msra.mxu1 %v3000_v57 }
 0xe21   :  { %2009 = vmatprep.subr.bf16.mxu1 %v3005_v34 }
 0xe24   :  { %2010 = vmatpush1.bf16.msra.mxu1 %v3003_v30 }
 0xe25   :  { %2011 = vmatprep.subr.bf16.mxu1 %v3008_v35 }
 0xe28   :  { %2012 = vmatpush1.bf16.msra.mxu1 %v3006_v20 }
 0xe29   :  { %2013 = vmatprep.subr.bf16.mxu1 %v3011_v21 }
 0xe2c   :  { %2014 = vmatpush1.bf16.msra.mxu1 %v3009_v11 }
 0xe2d   :  { %2015 = vmatprep.subr.bf16.mxu1 %v3014_v12 }
 0xe30   :  { %2016 = vmatpush1.bf16.msra.mxu1 %v3012_v36 }
 0xe31   :  { %2017 = vmatprep.subr.bf16.mxu1 %v3017_v59 }
 0xe34   :  { %2018 = vmatpush1.bf16.msra.mxu1 %v3015_v38 }
 0xe35   :  { %2019 = vmatprep.subr.bf16.mxu1 %v3020_v39 }
 0xe38   :  { %2020 = vmatpush1.bf16.msra.mxu1 %v3018_v40 }
 0xebb   :  { %v1410_v3 = vpop.f32.mrf.mxu1 }
 0xebc   :  { %v1411_v1 = vadd.f32 %v2506_v55, %v1410_v3 }
 0xebd   :  { %v2831_v2 = vpop.f32.mrf.mxu1 }
 0xebe   :  { %v1433_v8 = vpack.c.bf16 %v1411_v1, %v1411_v1 }
 0xebf   :  { %v1413_v28 = vpop.f32.mrf.mxu1 }
 0xec0   :  { %2850 = vmatmul.mubr.bf16.vlgmr.msra.gmra.mxu0 %v1433_v8 }
 0xec1   :  { %2854 = vmatpush3.bf16.msra.mxu0 %v2989_v6  ;;  %v2832_v13 = vpop.f32.mrf.mxu1  ;;  %2869 = vmatprep.mubr.msk.bf16.mxu0 %vm3230_vm0, %v3229_v0 }
 0xec2   :  { %2855 = vmatprep.subr.bf16.mxu0 %v3229_v0 }
 0xec5   :  { %2856 = vmatpush3.bf16.msra.mxu0 %v2990_v14 }
 0xec6   :  { %2857 = vmatprep.subr.bf16.mxu0 %v3229_v0 }
 0xec9   :  { %2858 = vmatpush3.bf16.msra.mxu0 %v2991_v15 }
 0xeca   :  { %2859 = vmatprep.subr.bf16.mxu0 %v3229_v0 }
 0xecd   :  { %2860 = vmatpush3.bf16.msra.mxu0 %v2992_v18 }
 0xece   :  { %2861 = vmatprep.subr.bf16.mxu0 %v3229_v0 }
 0xed1   :  { %2862 = vmatpush3.bf16.msra.mxu0 %v2993_v7 }
 0xed2   :  { %2863 = vmatprep.subr.bf16.mxu0 %v3229_v0 }
 0xed5   :  { %2864 = vmatpush3.bf16.msra.mxu0 %v2994_v19 }
 0xed6   :  { %2865 = vmatprep.subr.bf16.mxu0 %v3229_v0 }
 0xed9   :  { %2866 = vmatpush3.bf16.msra.mxu0 %v2995_v23 }
 0xeda   :  { %2867 = vmatprep.subr.bf16.mxu0 %v3229_v0 }
 0xedb   :  { %v2673_v24 = vpop.f32.mrf.mxu1 }
 0xedd   :  { %v2674_v25 = vpop.f32.mrf.mxu1  ;;  %2868 = vmatpush3.bf16.msra.mxu0 %v2996_v9 }
 0xede   :  { %v2675_v26 = vadd.f32 %v2674_v25, %v2673_v24  ;;  %2873 = vmatprep.subr.bf16.mxu0 %v3229_v0 }
 0xedf   :  { %v2676_v27 = vpop.f32.mrf.mxu1 }
 0xee0   :  { %2870 = vmatmul.mubr.bf16.vlgmr.msra.gmra.mxu0 %v1433_v8  ;;  %v1851_v54 = vadd.f32 %v2675_v26, %v2538_v53 }
 0xee1   :  { %v2677_v29 = vpop.f32.mrf.mxu1  ;;  %2889 = vmatprep.mubr.msk.bf16.mxu0 %vm3230_vm0, %v3229_v0 }
 0xf80   :  { %v1524_v16 = vpop.f32.mrf.mxu0 }
 0xf81   :  { %v3905_v45 = vadd.f32 %v2528_v42, %v1524_v16 }
 0xf82   :  { %v2851_v5 = vpop.f32.mrf.mxu0 }
 0xf83   :  { %v2537_v4 = vmul.f32 -1.442695, %v3905_v45 }
 0xf84   :  { %v1527_v48 = vpop.f32.mrf.mxu0 }
 0xf85   :  { %3089 = vpow2.f32 %v2537_v4 }
 0xf86   :  { %v2852_v50 = vpop.f32.mrf.mxu0 }
 0xf92   :  { %v3090_v10 = vpop.eup %3089 }
 0xf93   :  { %v1533_v52 = vadd.f32 1.0, %v3090_v10 }
 0xf95   :  { %3091 = vrcp.f32 %v1533_v52 }
 0xfa0   :  { %v1890_v56 = vpop.f32.mrf.mxu0 }
 0xfa1   :  { %v3911_v58 = vadd.f32 %v1890_v56, %v1851_v54 }
 0xfa2   :  { %v3092_v61 = vpop.eup %3091  ;;  %v2871_v55 = vpop.f32.mrf.mxu0 }
 0xfa3   :  { %v1543_v3 = vrot.slane %v3092_v61, %v3484_v43  ;;  %v1912_v1 = vpack.c.bf16 %v3911_v58, %v3911_v58  ;;  %2178 = vrot.lane.b32.xlu1 %v3092_v61, %s3226_s25  ;;  %v3021_v55 = vld [vmem:[%s4003_s11 + $0x38] sm:$0xff]  }
 0xfa4   :  { %v1893_v2 = vpop.f32.mrf.mxu0  ;;  %2874 = vmatpush3.bf16.msra.mxu0 %v3021_v55 }
 0xfa5   :  { %v1544_v6 = vcombine.high %v1543_v3, %v1543_v3  ;;  %v1551_v8 = vrot.slane %v1543_v3, %v3484_v43  ;;  %2038 = vmatmul.mubr.bf16.vlgmr.msra.gmra.mxu1 %v1912_v1  ;;  %2875 = vmatprep.subr.bf16.mxu0 %v3229_v0  ;;  %v3022_v3 = vld [vmem:[%s4003_s11 + $0x30] sm:$0xff]   ;;  %v3023_v1 = vld [vmem:[%s4003_s11 + $0x28] sm:$0xff]   ;;  %v3024_v2 = vld [vmem:[%s4003_s11 + $0x20] sm:$0xff]  }
 0xfa6   :  { %v2872_v28 = vpop.f32.mrf.mxu0 }
 0xfa7   :  { %v1562_v13 = vrot.slane %v1551_v8, %v3491_v46  ;;  %v1558_v14 = vrot.slane %v1544_v6, %v3484_v43  ;;  %v3025_v6 = vld [vmem:[%s4003_s11 + $0x18] sm:$0xff]   ;;  %v3026_v8 = vld [vmem:[%s4003_s11 + $0x10] sm:$0xff]   ;;  %v3027_v28 = vld [vmem:[%s4003_s11 + $0x8] sm:$0xff]  }
 0xfa8   :  { %2876 = vmatpush3.bf16.msra.mxu0 %v3022_v3 }
 0xfa9   :  { %v1569_v15 = vmul.f32 %v1562_v13, %v3692_v47  ;;  %v1566_v18 = vrot.slane %v1558_v14, %v3491_v46  ;;  %2877 = vmatprep.subr.bf16.mxu0 %v3229_v0  ;;  %v1921_v13 = vsub.s32 1, %v3371_v60  ;;  %v1913_v14 = vld [vmem:[#allocation8] sm:$0x3] }
 0xfab   :  { %v1571_v7 = vsel %vm1260_vm5, %v1569_v15, -inf  ;;  %v1570_v19 = vmul.f32 %v1566_v18, %v3696_v51 }
 0xfac   :  { %v1572_v23 = vrot.slane %v1571_v7, 4  ;;  %2878 = vmatpush3.bf16.msra.mxu0 %v3023_v1 }
 0xfad   :  { %v1578_v9 = vsel %vm1260_vm5, %v1570_v19, -inf  ;;  %2879 = vmatprep.subr.bf16.mxu0 %v3229_v0 }
 0xfae   :  { %v1573_v24 = vmax.f32 %v1571_v7, %v1572_v23  ;;  %v1579_v25 = vrot.slane %v1578_v9, 4 }
 0xfb0   :  { %v1574_v26 = vrot.slane %v1573_v24, 2  ;;  %v1580_v27 = vmax.f32 %v1578_v9, %v1579_v25  ;;  %2880 = vmatpush3.bf16.msra.mxu0 %v3024_v2 }
 0xfb1   :  { %2881 = vmatprep.subr.bf16.mxu0 %v3229_v0 }
 0xfb2   :  { %v1575_v29 = vmax.f32 %v1573_v24, %v1574_v26  ;;  %v1581_v37 = vrot.slane %v1580_v27, 2 }
 0xfb4   :  { %v1576_v31 = vrot.slane %v1575_v29, 1  ;;  %v1582_v32 = vmax.f32 %v1580_v27, %v1581_v37  ;;  %2882 = vmatpush3.bf16.msra.mxu0 %v3025_v6  ;;  %v1918_v27 = vrot.slane %v1913_v14, %v3491_v46 }
 0xfb5   :  { %2883 = vmatprep.subr.bf16.mxu0 %v3229_v0 }
 0xfb6   :  { %v1577_v43 = vmax.f32 %v1575_v29, %v1576_v31  ;;  %v1583_v57 = vrot.slane %v1582_v32, 1 }
 0xfb8   :  { %v1585_v47 = vsub.f32 %v1569_v15, %v1577_v43  ;;  %v1584_v34 = vmax.f32 %v1582_v32, %v1583_v57  ;;  %2884 = vmatpush3.bf16.msra.mxu0 %v3026_v8  ;;  %v1922_v15 = vrot.slane %v1913_v14, %v1921_v13 }
 0xfb9   :  { %2885 = vmatprep.subr.bf16.mxu0 %v3229_v0 }
 0xfba   :  { %v1587_v30 = vmul.f32 1.442695, %v1585_v47  ;;  %v1586_v35 = vsub.f32 %v1570_v19, %v1584_v34  ;;  %v2254_v34 = vpop.permute.xlu1 %2253 }
 0xfbc   :  { %3093 = vpow2.f32 %v1587_v30  ;;  %v1589_v20 = vmul.f32 1.442695, %v1586_v35  ;;  %2886 = vmatpush3.bf16.msra.mxu0 %v3027_v28 }
 0xfbd   :  { %2887 = vmatprep.subr.bf16.mxu0 %v3229_v0 }
 0xfbe   :  { %3095 = vpow2.f32 %v1589_v20  ;;  %v2262_v30 = vpop.permute.xlu1 %2261 }
 0xfc2   :  { %v2266_v35 = vpop.permute.xlu1 %2265 }
 0xfc6   :  { %v2270_v20 = vpop.permute.xlu1 %2269 }
 0xfc9   :  { %v3094_v51 = vpop.eup %3093 }
 0xfca   :  { %v1591_v21 = vsel %vm1260_vm5, %v3094_v51, 0.0  ;;  %v2274_v46 = vpop.permute.xlu1 %2273 }
 0xfcb   :  { %v3096_v11 = vpop.eup %3095  ;;  %v1592_v12 = vrot.slane %v1591_v21, 4 }
 0xfcc   :  { %v1598_v36 = vsel %vm1260_vm5, %v3096_v11, 0.0 }
 0xfcd   :  { %v1593_v59 = vadd.f32 %v1592_v12, %v1591_v21  ;;  %v1599_v38 = vrot.slane %v1598_v36, 4  ;;  %v2280_v12 = vsel %vm260_vm3, %v3398_v17, %v2254_v34 }
 0xfcf   :  { %v1594_v39 = vrot.slane %v1593_v59, 2  ;;  %v1600_v40 = vadd.f32 %v1599_v38, %v1598_v36 }
 0xfd1   :  { %v1595_v41 = vadd.f32 %v1594_v39, %v1593_v59  ;;  %v1601_v42 = vrot.slane %v1600_v40, 2 }
 0xfd3   :  { %v1596_v16 = vrot.slane %v1595_v41, 1  ;;  %v1602_v5 = vadd.f32 %v1601_v42, %v1600_v40  ;;  %v2278_v42 = vpop.permute.xlu1 %2277 }
 0xfd5   :  { %v1597_v4 = vadd.f32 %v1596_v16, %v1595_v41  ;;  %v1603_v48 = vrot.slane %v1602_v5, 1 }
 0xfd7   :  { %3097 = vrcp.f32 %v1597_v4  ;;  %v1604_v50 = vadd.f32 %v1603_v48, %v1602_v5 }
 0xfd9   :  { %3099 = vrcp.f32 %v1604_v50 }
 0xfe4   :  { %v3098_v10 = vpop.eup %3097 }
 0xfe5   :  { %v1607_v52 = vmul.f32 %v3098_v10, %v3094_v51  ;;  %v2580_v51 = vld [vmem:[%s4004_s12] ss:$0 sm:$0xff]  ;;  %s3243_s12 = smov 96  }
 0xfe6   :  { %v3100_v53 = vpop.eup %3099 }
 0xfe7   :  { %v1609_v54 = vsel %vm1260_vm5, %v1607_v52, 0.0  ;;  %v1608_v56 = vmul.f32 %v3100_v53, %v3096_v11 }
 0xfe8   :  { %1610 = vadd.xlane.f32.xlu1 %v1609_v54 }
 0xfe9   :  { %v1612_v61 = vsel %vm1260_vm5, %v1608_v56, 0.0 }
 0xfea   :  { %1613 = vadd.xlane.f32.xlu0 %v1612_v61 }
0x1000   :  { %2345 = vrot.lane.b32.xlu0 %v3905_v45, %s3241_s0  ;;  %v3028_v45 = vld [vmem:[%s4003_s11] sm:$0xff]  }
0x1001   :  { %2888 = vmatpush3.bf16.msra.mxu0 %v3028_v45 }
0x1004   :  { %2348 = vrot.lane.b32.xlu0 %v3486_v44, %s3242_s14 }
0x1015   :  { %v2179_v53 = vpop.permute.xlu1 %2178 }
0x1065   :  { %v2039_v18 = vpop.f32.mrf.mxu1 }
0x1066   :  { %v2040_v29 = vadd.f32 %v2039_v18, %v1918_v27 }
0x1067   :  { %v2041_v7 = vpop.f32.mrf.mxu1 }
0x1068   :  { %v2042_v19 = vadd.f32 %v2041_v7, %v1922_v15  ;;  %v2046_v0 = vmax.f32 %v2040_v29, 0.0 }
0x1069   :  { %v2043_v23 = vpop.f32.mrf.mxu1 }
0x106a   :  { %v2579_v9 = vmul.f32 -1.442695, %v2042_v19 }
0x106b   :  { %v2044_v24 = vpop.f32.mrf.mxu1 }
0x106c   :  { %3101 = vpow2.f32 %v2579_v9 }
0x1071   :  { %v1611_v3 = vpop.xlane.xlu1 %1610 }
0x1072   :  { %v1615_v28 = vmul.f32 0.0625, %v1611_v3 }
0x1079   :  { %v3102_v25 = vpop.eup %3101 }
0x107a   :  { %v2050_v26 = vadd.f32 1.0, %v3102_v25 }
0x107c   :  { %3103 = vrcp.f32 %v2050_v26 }
0x1089   :  { %v3104_v37 = vpop.eup %3103 }
0x108a   :  { %v2054_v31 = vsub.f32 1.0, %v3104_v37  ;;  %v2053_v32 = vmul.f32 %v3104_v37, %v2046_v0 }
0x108c   :  { %v2055_v43 = vmul.f32 %v2054_v31, %v3911_v58  ;;  %v2258_v58 = vpop.permute.xlu0 %2257 }
0x108d   :  { %v2281_v38 = vsel %vm1260_vm5, %v2280_v12, %v2258_v58 }
0x108e   :  { %v2056_v57 = vadd.f32 %v2055_v43, %v2053_v32  ;;  %v2283_v39 = vsel %vm2282_vm6, %v2281_v38, %v2262_v30 }
0x108f   :  { %v2284_v41 = vsel %vm101_vm1, %v2283_v39, %v2266_v35 }
0x1090   :  { %v2073_v47 = vpack.c.bf16 %v2056_v57, %v2056_v57  ;;  %v2286_v17 = vsel %vm2285_vm7, %v2284_v41, %v2270_v20  ;;  %v2176_v10 = vpop.permute.xlu0 %2175 }
0x1091   :  { %v2288_v16 = vsel %vm2287_vm8, %v2286_v17, %v2274_v46  ;;  %v2181_v61 = vsel %vm260_vm3, %v3486_v44, %v2176_v10 }
0x1092   :  { %2890 = vmatmul.mubr.bf16.vlgmr.msra.gmra.mxu0 %v2073_v47  ;;  %v2290_v5 = vsel %vm2289_vm9, %v2288_v16, %v2278_v42  ;;  %v2182_v55 = vsel %vm1260_vm5, %v2181_v61, %v2179_v53 }
0x1093   :  { %v2184_v6 = vmul.f32 0.5, %v2182_v55 }
0x1094   :  { %v2338_v52 = vpop.permute.xlu0 %2337 }
0x1098   :  { %v1614_v56 = vpop.xlane.xlu0 %1613 }
0x1099   :  { %v1616_v1 = vmul.f32 0.0625, %v1614_v56 }
0x109c   :  { %v2346_v7 = vpop.permute.xlu0 %2345 }
0x10a0   :  { %v2349_v27 = vpop.permute.xlu0 %2348 }
0x1152   :  { %v2163_v21 = vpop.f32.mrf.mxu0 }
0x1153   :  { %v2164_v11 = vadd.f32 %v2580_v51, %v2163_v21 }
0x1154   :  { %v2891_v36 = vpop.f32.mrf.mxu0 }
0x1155   :  { %2292 = vrot.lane.b32.xlu1 %v2164_v11, %s3233_s17  ;;  %v2589_v4 = vmul.f32 -1.442695, %v2164_v11 }
0x1156   :  { %v2166_v59 = vpop.f32.mrf.mxu0 }
0x1157   :  { %3105 = vpow2.f32 %v2589_v4 }
0x1158   :  { %v2892_v40 = vpop.f32.mrf.mxu0 }
0x1159   :  { %2341 = vrot.lane.b32.xlu1 %v3624_v63, %s3243_s12  ;;  %v2325_v63 = vadd.s32 4294967216, %v3508_v49 }
0x115b   :  { %v2328_v8 = vsub.s32 %v2325_v63, %v3371_v60 }
0x115d   :  { %2352 = vrot.lane.b32.xlu1 %v2290_v5, %s3224_s19  ;;  %v2333_v45 = vrot.slane %v1616_v1, %v2328_v8  ;;  %v2329_v15 = vrot.slane %v1615_v28, %v2328_v8  ;;  %s3244_s19 = smov [#allocation10]  }
0x115e   :  { %s2389_s17 = sshll.u32 %s3244_s19, 4  ;;  %s2390_s17 = int_to_ptr.vmem [resolvable:$true] %s2389_s17 }
0x115f   :  { %v2334_v49 = vsel %vm325_vm4, %v2333_v45, %v2329_v15  ;;  %s3191_s18 = scalar_lea.vmem %s2390_s17, 64  ;;  %p3196_p7 = scmp.lt.s32.totalorder %s2390_s17, %s2390_s17 }
0x1160   :  { %p3192_p6 = scmp.ne.s32.totalorder %s2390_s17, %s3191_s18  ;;  %p3197_p8 = scmp.lt.s32.totalorder %s3191_s18, %s3191_s18 }
0x1162   :  { %p3198_p9 = por %p3197_p8, %p3196_p7 }
0x1164   :  { %v3106_v48 = vpop.eup %3105  ;;  %p3199_p10 = pnand %p3198_p9, %p3192_p6 }
0x1165   :  { %v2172_v50 = vadd.f32 1.0, %v3106_v48 }
0x1167   :  { %3107 = vrcp.f32 %v2172_v50 }
0x1174   :  { %v3108_v54 = vpop.eup %3107 }
0x1175   :  { %v2183_v2 = vmul.f32 0.5, %v3108_v54 }
0x1177   :  { %v2185_v13 = vadd.f32 %v2184_v6, %v2183_v2 }
0x11c7   :  { %v2293_v14 = vpop.permute.xlu1 %2292 }
0x11c8   :  { %v2355_v18 = vsel %vm101_vm1, %v2185_v13, %v2293_v14 }
0x11c9   :  { %v2356_v44 = vsel %vm215_vm2, %v2355_v18, %v3521_v62 }
0x11ca   :  { %v2358_v60 = vsel %vm2357_vm10, %v2356_v44, %v3664_v33 }
0x11cb   :  { %v2342_v19 = vpop.permute.xlu1 %2341  ;;  %v2360_v23 = vsel %vm2359_vm11, %v2358_v60, %v2334_v49 }
0x11cc   :  { %v2362_v9 = vsel %vm2361_vm12, %v2360_v23, %v2338_v52 }
0x11cd   :  { %v2364_v24 = vsel %vm2363_vm13, %v2362_v9, %v2342_v19 }
0x11ce   :  { %v2366_v25 = vsel %vm2365_vm14, %v2364_v24, %v2346_v7 }
0x11cf   :  { %v2353_v26 = vpop.permute.xlu1 %2352  ;;  %v2368_v37 = vsel %vm2367_vm15, %v2366_v25, %v2349_v27 }
0x11d0   :  { %v2369_v62 = vsel %vm260_vm3, %v3627_v22, %v2353_v26 }
0x11d1   :  { %v2370_v29 = vsel %vm2357_vm10, %v2369_v62, 0.0 }
0x11d2   :  { %v2373_v0 = vcombine.low %v2368_v37, %v2370_v29 }
0x11d4   :  { %2590 = vst.sshfl [vmem:[#allocation10] sm:$0x33 pattern:$0x76325410] %v2373_v0 }
0x11d5   :  { %3202 = shalt.err (!%p3199_p10)
}
0x11d6   :  { %2392 = dma.vmem_to_hbm [thread:$0]  %s2390_s17, 64, %s4005_s13, [#allocation4]  }
0x11d7   :  { %3217 = dma.done.wait [#allocation4], 64  }
0x11d8   :  { %3218 = vsyncadd [#allocation4], 4294967232 }
0x11d9   :  { %2396 = vsyncpa [#allocation3], 1 }
0x11da   :  { %2397 = vsyncpa [#allocation6], 1 }
0x11db   :  { %2398 = vsyncpa [#allocation9], 1 }
0x11dc   :  { %2399 = vsyncpa [#allocation4], 1 }

</bundles_post_ra>
